<compile_context>
chip_gen: v6e
topology: v6e:2x2x1
jax: 0.10.0
libtpu: 0.0.40
codegen_flags: <defaults>
</compile_context>

<pallas_src>
import math

import jax
import jax.numpy as jnp
import numpy as np
from jax import lax
from jax.experimental import pallas as pl
from jax.experimental.pallas import tpu as pltpu

# Operand dtype for the MXU matmuls (accumulation is always f32).  Flip to
# jnp.bfloat16 for large problems (and loosen the test tolerance accordingly).
MATMUL_DTYPE = jnp.float32


# ------------------------------ kernel helpers -------------------------------

def _roll_h(x, shift):
    """Static circular roll along axis 1 (the H/sublane axis of [B, H, W*C]):
    y[:, i] = x[:, (i - shift) % L]."""
    L = x.shape[1]
    s = shift % L
    if s == 0:
        return x
    hi = lax.slice_in_dim(x, L - s, L, axis=1)
    lo = lax.slice_in_dim(x, 0, L - s, axis=1)
    return jnp.concatenate([hi, lo], axis=1)


def _make_kernel(num_layers, k, L, out2):
    """out2 = 2 * out_channels (number of channels of the final conv)."""
    p = (k - 1) // 2

    def kernel(*refs):
        state_ref = refs[0]
        param_refs = refs[1:1 + 2 * num_layers]
        out_ref = refs[1 + 2 * num_layers]

        state = state_ref[...]                       # [tb, L, L] f32
        tb = state.shape[0]

        # ---- Marshall phase (per sample), mask built once per invocation ----
        ih = lax.broadcasted_iota(jnp.int32, (L, L), 0)
        iw = lax.broadcasted_iota(jnp.int32, (L, L), 1)
        even_mask = ((ih + iw) % 2 == 0).astype(jnp.float32)
        phase = jnp.sum(state * even_mask[None], axis=(1, 2), keepdims=True)
        phase = math.pi * jnp.fmod(phase + 1.0, 2.0)  # [tb, 1, 1]

        # ---- conv stack in lane-dense [tb, H, W*C] layout ----
        # h[b, h, w*Cin + c] == x[b, c, h, w];  layer 0 has Cin = 1.
        h = state
        for li in range(num_layers):
            w = param_refs[2 * li][...]              # [k*L*Cin, L*Cout]
            b = param_refs[2 * li + 1][...]          # [1, L*Cout]
            # k row-shifted copies (circular, H direction), concat along lanes:
            # cols[b, h, dy*(L*Cin) + w*Cin + c] = x[b, c, (h+dy-p)%L, w]
            cols = jnp.concatenate(
                [_roll_h(h, p - dy) for dy in range(k)], axis=-1)
            lhs = cols.reshape(tb * L, cols.shape[-1]).astype(w.dtype)
            # Single matmul per layer: the W-direction circular conv is folded
            # into the pre-expanded weight (contraction = k*L*Cin).
            y = jnp.dot(lhs, w, preferred_element_type=jnp.float32) + b
            if li < num_layers - 1:                  # ReLU on all but final conv
                y = jnp.maximum(y, 0.0)
            h = y.reshape(tb, L, y.shape[-1])

        # ---- add Marshall phase to the 'im' half of each per-site group ----
        # output lanes are ordered  w*(2*OC) + o ; im channels are o >= OC.
        width = h.shape[-1]                          # L * 2 * out_channels
        lane = lax.broadcasted_iota(jnp.int32, (1, 1, width), 2)
        im_mask = ((lane % out2) >= (out2 // 2)).astype(jnp.float32)
        out_ref[...] = h + phase * im_mask

    return kernel


# --------------------------- wrapper / preprocessing --------------------------

def _expand_weight(w, L):
    """Fold the W-direction circular conv into a dense matmul weight.

    w:       [Cout, Cin, k, k]   (PyTorch OIHW)
    returns: [k * L * Cin, L * Cout]  such that for the lane-dense im2col
             cols[b,h, dy*(L*Cin) + w_in*Cin + c] = x[b,c,(h+dy-p)%L, w_in]
             we have  cols_2d @ Wexp == conv(x) (bias excluded).
    """
    cout, cin, kh, kw = w.shape
    p = (kw - 1) // 2
    w_out = np.arange(L)
    sel = np.zeros((kw, L, L), np.float32)           # sel[dx, w_in, w_out]
    for dx in range(kw):
        w_in = (w_out + dx - p) % L
        sel[dx, w_in, w_out] += 1.0
    # wexp[dy, w_in, c, w_out, o] = sum_dx sel[dx, w_in, w_out] * w[o, c, dy, dx]
    wexp = jnp.einsum('xiw,ocyx->yicwo', jnp.asarray(sel), w)
    return wexp.reshape(kh * L * cin, L * cout)


def heisenberg_periodic_cnn_forward(state, params, kernel_size,
                                    batch_block=None):
    """state: [B, L, L] f32; params: list of (weight [O,I,k,k], bias [O]).

    Returns (re_out, im_out), each [B, out_channels, L, L] (NCHW), matching
    the PyTorch module.
    """
    B, L, _ = state.shape
    num_layers = len(params)
    out2 = params[-1][0].shape[0]                    # 2 * out_channels
    out_c = out2 // 2

    if batch_block is None:
        # >= 2 grid steps when B > 1 (v7x megacore), capped for VMEM residency,
        # and forced to divide B exactly.
        batch_block = math.gcd(B, max(1, min(8, (B + 1) // 2)))
    tb = batch_block
    assert B % tb == 0, "batch_block must divide the batch size"

    flat_inputs = [state]
    in_specs = [pl.BlockSpec((tb, L, L), lambda i: (i, 0, 0))]
    for (w, b) in params:
        cout = w.shape[0]
        wexp = _expand_weight(w, L).astype(MATMUL_DTYPE)   # [k*L*Cin, L*Cout]
        bexp = jnp.tile(b, (L,)).reshape(1, L * cout)      # [1, L*Cout]
        flat_inputs += [wexp, bexp]
        in_specs += [pl.BlockSpec(wexp.shape, lambda i: (0, 0)),
                     pl.BlockSpec(bexp.shape, lambda i: (0, 0))]

    width = L * out2
    out = pl.pallas_call(
        _make_kernel(num_layers, kernel_size, L, out2),
        grid=(B // tb,),
        out_shape=jax.ShapeDtypeStruct((B, L, width), jnp.float32),
        in_specs=in_specs,
        out_specs=pl.BlockSpec((tb, L, width), lambda i: (i, 0, 0)),
        compiler_params=pltpu.CompilerParams(
            dimension_semantics=("parallel",)),
    )(*flat_inputs)

    # Split re/im and move to NCHW outside the kernel (cheap XLA ops).
    out = out.reshape(B, L, L, out2)
    re = jnp.transpose(out[..., :out_c], (0, 3, 1, 2))
    im = jnp.transpose(out[..., out_c:], (0, 3, 1, 2))
    return re, im


# ------------------------- parameter construction ---------------------------

def build_params(key, hidden_channels, out_channels, lattice_size, kernel_size,
                 zero_final_weight=True):
    """Deterministic Conv2d-style init (uniform +-1/sqrt(fan_in))."""
    if (lattice_size - 1) % (kernel_size - 1) == 0 and kernel_size % 2 != 0:
        num_inner = (lattice_size - 1) // (kernel_size - 1)
    else:
        num_inner = 1 + (lattice_size - 1) // (kernel_size - 1)

    layer_dims = ([(1, hidden_channels)]
                  + [(hidden_channels, hidden_channels)] * num_inner
                  + [(hidden_channels, 2 * out_channels)])

    params = []
    for i, (cin, cout) in enumerate(layer_dims):
        key, wk, bk = jax.random.split(key, 3)
        fan_in = cin * kernel_size * kernel_size
        bound = 1.0 / math.sqrt(fan_in)
        w = jax.random.uniform(wk, (cout, cin, kernel_size, kernel_size),
                               jnp.float32, -bound, bound)
        b = jax.random.uniform(bk, (cout,), jnp.float32, -bound, bound)
        if zero_final_weight and i == len(layer_dims) - 1:
            w = w * 0.0   # matches `self.final_layer.weight.data *= 0.0`
        params.append((w, b))
    return params


# ---------------------------- pure-JAX reference ----------------------------

def reference_forward(state, params, kernel_size):
    p = (kernel_size - 1) // 2
    h = state[:, None]                       # [B, 1, L, L]
    n = len(params)
    for i, (w, b) in enumerate(params):
        hp = jnp.pad(h, ((0, 0), (0, 0), (p, p), (p, p)), mode='wrap')
        h = lax.conv_general_dilated(
            hp, w, (1, 1), 'VALID',
            dimension_numbers=('NCHW', 'OIHW', 'NCHW'),
            precision=lax.Precision.HIGHEST) + b[None, :, None, None]
        if i < n - 1:
            h = jnp.maximum(h, 0.0)
    C = h.shape[1] // 2
    re, im = h[:, :C], h[:, C:]
    sub = state[:, 0::2, 0::2] + state[:, 1::2, 1::2]
    phase = jnp.sum(sub, axis=(-1, -2)) + 1.0
    phase = math.pi * jnp.fmod(phase, 2.0)
    im = im + phase[:, None, None, None]
    return re, im


# ----------------------------------- main ------------------------------------

if __name__ == "__main__":
    # Small hparams consistent with the module (potential='xy' -> out_channels=4).
    batch = 2
    lattice_size = 8
    hidden_channels = 16
    kernel_size = 3
    out_channels = 4

    key = jax.random.PRNGKey(0)
    key, skey, pkey = jax.random.split(key, 3)
    state = jax.random.normal(skey, (batch, lattice_size, lattice_size),
                              jnp.float32)

    # Faithful module params (final-layer weight zeroed, as in __init__).
    params = build_params(pkey, hidden_channels, out_channels,
                          lattice_size, kernel_size, zero_final_weight=True)

    re_out, im_out = heisenberg_periodic_cnn_forward(state, params, kernel_size)
    jax.block_until_ready((re_out, im_out))

    re_ref, im_ref = reference_forward(state, params, kernel_size)
    np.testing.assert_allclose(np.asarray(re_out), np.asarray(re_ref),
                               rtol=5e-3, atol=5e-3)
    np.testing.assert_allclose(np.asarray(im_out), np.asarray(im_ref),
                               rtol=5e-3, atol=5e-3)

    # Extra check with a non-zero final weight so the conv stack is exercised
    # end-to-end in the comparison.
    params_nz = build_params(pkey, hidden_channels, out_channels,
                             lattice_size, kernel_size, zero_final_weight=False)
    re2, im2 = heisenberg_periodic_cnn_forward(state, params_nz, kernel_size)
    jax.block_until_ready((re2, im2))
    re2_ref, im2_ref = reference_forward(state, params_nz, kernel_size)
    np.testing.assert_allclose(np.asarray(re2), np.asarray(re2_ref),
                               rtol=5e-3, atol=5e-3)
    np.testing.assert_allclose(np.asarray(im2), np.asarray(im2_ref),
                               rtol=5e-3, atol=5e-3)

    print("KERNEL_OK")
</pallas_src>

<mosaic_0001>
module attributes {stable_mosaic.version = 11 : i64} {
  func.func @kernel(%arg0: i32, %arg1: memref<1x8x8xf32, #tpu.memory_space<vmem>>, %arg2: memref<24x128xf32, #tpu.memory_space<vmem>>, %arg3: memref<1x128xf32, #tpu.memory_space<vmem>>, %arg4: memref<384x128xf32, #tpu.memory_space<vmem>>, %arg5: memref<1x128xf32, #tpu.memory_space<vmem>>, %arg6: memref<384x128xf32, #tpu.memory_space<vmem>>, %arg7: memref<1x128xf32, #tpu.memory_space<vmem>>, %arg8: memref<384x128xf32, #tpu.memory_space<vmem>>, %arg9: memref<1x128xf32, #tpu.memory_space<vmem>>, %arg10: memref<384x128xf32, #tpu.memory_space<vmem>>, %arg11: memref<1x128xf32, #tpu.memory_space<vmem>>, %arg12: memref<384x64xf32, #tpu.memory_space<vmem>>, %arg13: memref<1x64xf32, #tpu.memory_space<vmem>>, %arg14: memref<1x8x64xf32, #tpu.memory_space<vmem>>) attributes {dimension_semantics = [#tpu.dimension_semantics<parallel>], iteration_bounds = array<i64: 2>, scalar_prefetch = 0 : i64, scratch_operands = 0 : i64, tpu.core_type = #tpu.core_type<tc>, window_params = [{transform_indices = @transform_0, window_bounds = array<i64: 1, 8, 8>}, {pipeline_mode = #tpu.pipeline_mode<synchronous>, transform_indices = @transform_1, window_bounds = array<i64: 24, 128>}, {pipeline_mode = #tpu.pipeline_mode<synchronous>, transform_indices = @transform_2, window_bounds = array<i64: 1, 128>}, {pipeline_mode = #tpu.pipeline_mode<synchronous>, transform_indices = @transform_3, window_bounds = array<i64: 384, 128>}, {pipeline_mode = #tpu.pipeline_mode<synchronous>, transform_indices = @transform_4, window_bounds = array<i64: 1, 128>}, {pipeline_mode = #tpu.pipeline_mode<synchronous>, transform_indices = @transform_5, window_bounds = array<i64: 384, 128>}, {pipeline_mode = #tpu.pipeline_mode<synchronous>, transform_indices = @transform_6, window_bounds = array<i64: 1, 128>}, {pipeline_mode = #tpu.pipeline_mode<synchronous>, transform_indices = @transform_7, window_bounds = array<i64: 384, 128>}, {pipeline_mode = #tpu.pipeline_mode<synchronous>, transform_indices = @transform_8, window_bounds = array<i64: 1, 128>}, {pipeline_mode = #tpu.pipeline_mode<synchronous>, transform_indices = @transform_9, window_bounds = array<i64: 384, 128>}, {pipeline_mode = #tpu.pipeline_mode<synchronous>, transform_indices = @transform_10, window_bounds = array<i64: 1, 128>}, {pipeline_mode = #tpu.pipeline_mode<synchronous>, transform_indices = @transform_11, window_bounds = array<i64: 384, 64>}, {pipeline_mode = #tpu.pipeline_mode<synchronous>, transform_indices = @transform_12, window_bounds = array<i64: 1, 64>}, {transform_indices = @transform_13, window_bounds = array<i64: 1, 8, 64>}]} {
    %c0 = arith.constant 0 : index
    %c0_0 = arith.constant 0 : index
    %c0_1 = arith.constant 0 : index
    %0 = vector.load %arg1[%c0, %c0_0, %c0_1] : memref<1x8x8xf32, #tpu.memory_space<vmem>>, vector<1x8x8xf32>
    %1 = tpu.iota {dimensions = array<i32: 0>} : vector<8x8xi32>
    %2 = tpu.iota {dimensions = array<i32: 1>} : vector<8x8xi32>
    %3 = arith.addi %1, %2 : vector<8x8xi32>
    %c2_i32 = arith.constant 2 : i32
    %c0_i32 = arith.constant 0 : i32
    %4 = arith.cmpi eq, %c2_i32, %c0_i32 : i32
    %c1_i32 = arith.constant 1 : i32
    %5 = arith.select %4, %c1_i32, %c2_i32 : i32
    %6 = vector.broadcast %5 : i32 to vector<8x8xi32>
    %7 = arith.remsi %3, %6 : vector<8x8xi32>
    %c0_i32_2 = arith.constant 0 : i32
    %8 = vector.broadcast %c0_i32_2 : i32 to vector<8x8xi32>
    %9 = arith.cmpi ne, %7, %8 : vector<8x8xi32>
    %c0_i32_3 = arith.constant 0 : i32
    %10 = vector.broadcast %c0_i32_3 : i32 to vector<8x8xi32>
    %11 = arith.cmpi slt, %7, %10 : vector<8x8xi32>
    %c0_i32_4 = arith.constant 0 : i32
    %12 = arith.cmpi slt, %5, %c0_i32_4 : i32
    %13 = vector.broadcast %12 : i1 to vector<8x8xi1>
    %14 = vector.broadcast %13 : vector<8x8xi1> to vector<8x8xi1>
    %15 = arith.xori %11, %14 : vector<8x8xi1>
    %16 = arith.andi %15, %9 : vector<8x8xi1>
    %17 = vector.broadcast %5 : i32 to vector<8x8xi32>
    %18 = arith.addi %7, %17 : vector<8x8xi32>
    %19 = arith.select %16, %18, %7 : vector<8x8xi1>, vector<8x8xi32>
    %c0_i32_5 = arith.constant 0 : i32
    %20 = vector.broadcast %c0_i32_5 : i32 to vector<8x8xi32>
    %21 = arith.cmpi eq, %19, %20 : vector<8x8xi32>
    %22 = arith.extui %21 : vector<8x8xi1> to vector<8x8xi32>
    %23 = arith.sitofp %22 : vector<8x8xi32> to vector<8x8xf32>
    %24 = vector.shape_cast %23 : vector<8x8xf32> to vector<1x8x8xf32>
    %25 = arith.mulf %0, %24 : vector<1x8x8xf32>
    %cst = arith.constant dense<0.000000e+00> : vector<1xf32>
    %26 = vector.multi_reduction <add>, %25, %cst [1, 2] : vector<1x8x8xf32> to vector<1xf32>
    %27 = vector.shape_cast %26 : vector<1xf32> to vector<1x1x1xf32>
    %cst_6 = arith.constant 1.000000e+00 : f32
    %28 = vector.broadcast %cst_6 : f32 to vector<1x1x1xf32>
    %29 = arith.addf %27, %28 : vector<1x1x1xf32>
    %cst_7 = arith.constant 2.000000e+00 : f32
    %30 = vector.broadcast %cst_7 : f32 to vector<1x1x1xf32>
    %31 = arith.remf %29, %30 : vector<1x1x1xf32>
    %cst_8 = arith.constant 3.14159274 : f32
    %32 = vector.broadcast %cst_8 : f32 to vector<1x1x1xf32>
    %33 = arith.mulf %32, %31 : vector<1x1x1xf32>
    %c0_9 = arith.constant 0 : index
    %c0_10 = arith.constant 0 : index
    %34 = vector.load %arg2[%c0_9, %c0_10] : memref<24x128xf32, #tpu.memory_space<vmem>>, vector<24x128xf32>
    %c0_11 = arith.constant 0 : index
    %c0_12 = arith.constant 0 : index
    %35 = vector.load %arg3[%c0_11, %c0_12] : memref<1x128xf32, #tpu.memory_space<vmem>>, vector<1x128xf32>
    %36 = vector.extract_strided_slice %0 {offsets = [0, 7, 0], sizes = [1, 1, 8], strides = [1, 1, 1]} : vector<1x8x8xf32> to vector<1x1x8xf32>
    %37 = vector.extract_strided_slice %0 {offsets = [0, 0, 0], sizes = [1, 7, 8], strides = [1, 1, 1]} : vector<1x8x8xf32> to vector<1x7x8xf32>
    %38 = tpu.concatenate %36, %37 in 1 : vector<1x1x8xf32>, vector<1x7x8xf32> -> vector<1x8x8xf32>
    %39 = vector.extract_strided_slice %0 {offsets = [0, 1, 0], sizes = [1, 7, 8], strides = [1, 1, 1]} : vector<1x8x8xf32> to vector<1x7x8xf32>
    %40 = vector.extract_strided_slice %0 {offsets = [0, 0, 0], sizes = [1, 1, 8], strides = [1, 1, 1]} : vector<1x8x8xf32> to vector<1x1x8xf32>
    %41 = tpu.concatenate %39, %40 in 1 : vector<1x7x8xf32>, vector<1x1x8xf32> -> vector<1x8x8xf32>
    %42 = tpu.concatenate %38, %0, %41 in 2 : vector<1x8x8xf32>, vector<1x8x8xf32>, vector<1x8x8xf32> -> vector<1x8x24xf32>
    %43 = vector.shape_cast %42 : vector<1x8x24xf32> to vector<8x24xf32>
    %cst_13 = arith.constant dense<0.000000e+00> : vector<8x128xf32>
    %44 = tpu.matmul %43, %34, %cst_13 {dimension_numbers = #tpu.dot_dimension_numbers<[1], [0], [0], [1], [0, 0, 1, 1], [], []>} : vector<8x24xf32>, vector<24x128xf32>, vector<8x128xf32> -> vector<8x128xf32>
    %45 = vector.broadcast %35 : vector<1x128xf32> to vector<8x128xf32>
    %46 = arith.addf %44, %45 : vector<8x128xf32>
    %cst_14 = arith.constant 0.000000e+00 : f32
    %47 = vector.broadcast %cst_14 : f32 to vector<8x128xf32>
    %48 = arith.maximumf %46, %47 : vector<8x128xf32>
    %49 = vector.shape_cast %48 : vector<8x128xf32> to vector<1x8x128xf32>
    %c0_15 = arith.constant 0 : index
    %c0_16 = arith.constant 0 : index
    %50 = vector.load %arg4[%c0_15, %c0_16] : memref<384x128xf32, #tpu.memory_space<vmem>>, vector<384x128xf32>
    %c0_17 = arith.constant 0 : index
    %c0_18 = arith.constant 0 : index
    %51 = vector.load %arg5[%c0_17, %c0_18] : memref<1x128xf32, #tpu.memory_space<vmem>>, vector<1x128xf32>
    %52 = vector.extract_strided_slice %49 {offsets = [0, 7, 0], sizes = [1, 1, 128], strides = [1, 1, 1]} : vector<1x8x128xf32> to vector<1x1x128xf32>
    %53 = vector.extract_strided_slice %49 {offsets = [0, 0, 0], sizes = [1, 7, 128], strides = [1, 1, 1]} : vector<1x8x128xf32> to vector<1x7x128xf32>
    %54 = tpu.concatenate %52, %53 in 1 : vector<1x1x128xf32>, vector<1x7x128xf32> -> vector<1x8x128xf32>
    %55 = vector.extract_strided_slice %49 {offsets = [0, 1, 0], sizes = [1, 7, 128], strides = [1, 1, 1]} : vector<1x8x128xf32> to vector<1x7x128xf32>
    %56 = vector.extract_strided_slice %49 {offsets = [0, 0, 0], sizes = [1, 1, 128], strides = [1, 1, 1]} : vector<1x8x128xf32> to vector<1x1x128xf32>
    %57 = tpu.concatenate %55, %56 in 1 : vector<1x7x128xf32>, vector<1x1x128xf32> -> vector<1x8x128xf32>
    %58 = tpu.concatenate %54, %49, %57 in 2 : vector<1x8x128xf32>, vector<1x8x128xf32>, vector<1x8x128xf32> -> vector<1x8x384xf32>
    %59 = vector.shape_cast %58 : vector<1x8x384xf32> to vector<8x384xf32>
    %cst_19 = arith.constant dense<0.000000e+00> : vector<8x128xf32>
    %60 = tpu.matmul %59, %50, %cst_19 {dimension_numbers = #tpu.dot_dimension_numbers<[1], [0], [0], [1], [0, 0, 1, 1], [], []>} : vector<8x384xf32>, vector<384x128xf32>, vector<8x128xf32> -> vector<8x128xf32>
    %61 = vector.broadcast %51 : vector<1x128xf32> to vector<8x128xf32>
    %62 = arith.addf %60, %61 : vector<8x128xf32>
    %cst_20 = arith.constant 0.000000e+00 : f32
    %63 = vector.broadcast %cst_20 : f32 to vector<8x128xf32>
    %64 = arith.maximumf %62, %63 : vector<8x128xf32>
    %65 = vector.shape_cast %64 : vector<8x128xf32> to vector<1x8x128xf32>
    %c0_21 = arith.constant 0 : index
    %c0_22 = arith.constant 0 : index
    %66 = vector.load %arg6[%c0_21, %c0_22] : memref<384x128xf32, #tpu.memory_space<vmem>>, vector<384x128xf32>
    %c0_23 = arith.constant 0 : index
    %c0_24 = arith.constant 0 : index
    %67 = vector.load %arg7[%c0_23, %c0_24] : memref<1x128xf32, #tpu.memory_space<vmem>>, vector<1x128xf32>
    %68 = vector.extract_strided_slice %65 {offsets = [0, 7, 0], sizes = [1, 1, 128], strides = [1, 1, 1]} : vector<1x8x128xf32> to vector<1x1x128xf32>
    %69 = vector.extract_strided_slice %65 {offsets = [0, 0, 0], sizes = [1, 7, 128], strides = [1, 1, 1]} : vector<1x8x128xf32> to vector<1x7x128xf32>
    %70 = tpu.concatenate %68, %69 in 1 : vector<1x1x128xf32>, vector<1x7x128xf32> -> vector<1x8x128xf32>
    %71 = vector.extract_strided_slice %65 {offsets = [0, 1, 0], sizes = [1, 7, 128], strides = [1, 1, 1]} : vector<1x8x128xf32> to vector<1x7x128xf32>
    %72 = vector.extract_strided_slice %65 {offsets = [0, 0, 0], sizes = [1, 1, 128], strides = [1, 1, 1]} : vector<1x8x128xf32> to vector<1x1x128xf32>
    %73 = tpu.concatenate %71, %72 in 1 : vector<1x7x128xf32>, vector<1x1x128xf32> -> vector<1x8x128xf32>
    %74 = tpu.concatenate %70, %65, %73 in 2 : vector<1x8x128xf32>, vector<1x8x128xf32>, vector<1x8x128xf32> -> vector<1x8x384xf32>
    %75 = vector.shape_cast %74 : vector<1x8x384xf32> to vector<8x384xf32>
    %cst_25 = arith.constant dense<0.000000e+00> : vector<8x128xf32>
    %76 = tpu.matmul %75, %66, %cst_25 {dimension_numbers = #tpu.dot_dimension_numbers<[1], [0], [0], [1], [0, 0, 1, 1], [], []>} : vector<8x384xf32>, vector<384x128xf32>, vector<8x128xf32> -> vector<8x128xf32>
    %77 = vector.broadcast %67 : vector<1x128xf32> to vector<8x128xf32>
    %78 = arith.addf %76, %77 : vector<8x128xf32>
    %cst_26 = arith.constant 0.000000e+00 : f32
    %79 = vector.broadcast %cst_26 : f32 to vector<8x128xf32>
    %80 = arith.maximumf %78, %79 : vector<8x128xf32>
    %81 = vector.shape_cast %80 : vector<8x128xf32> to vector<1x8x128xf32>
    %c0_27 = arith.constant 0 : index
    %c0_28 = arith.constant 0 : index
    %82 = vector.load %arg8[%c0_27, %c0_28] : memref<384x128xf32, #tpu.memory_space<vmem>>, vector<384x128xf32>
    %c0_29 = arith.constant 0 : index
    %c0_30 = arith.constant 0 : index
    %83 = vector.load %arg9[%c0_29, %c0_30] : memref<1x128xf32, #tpu.memory_space<vmem>>, vector<1x128xf32>
    %84 = vector.extract_strided_slice %81 {offsets = [0, 7, 0], sizes = [1, 1, 128], strides = [1, 1, 1]} : vector<1x8x128xf32> to vector<1x1x128xf32>
    %85 = vector.extract_strided_slice %81 {offsets = [0, 0, 0], sizes = [1, 7, 128], strides = [1, 1, 1]} : vector<1x8x128xf32> to vector<1x7x128xf32>
    %86 = tpu.concatenate %84, %85 in 1 : vector<1x1x128xf32>, vector<1x7x128xf32> -> vector<1x8x128xf32>
    %87 = vector.extract_strided_slice %81 {offsets = [0, 1, 0], sizes = [1, 7, 128], strides = [1, 1, 1]} : vector<1x8x128xf32> to vector<1x7x128xf32>
    %88 = vector.extract_strided_slice %81 {offsets = [0, 0, 0], sizes = [1, 1, 128], strides = [1, 1, 1]} : vector<1x8x128xf32> to vector<1x1x128xf32>
    %89 = tpu.concatenate %87, %88 in 1 : vector<1x7x128xf32>, vector<1x1x128xf32> -> vector<1x8x128xf32>
    %90 = tpu.concatenate %86, %81, %89 in 2 : vector<1x8x128xf32>, vector<1x8x128xf32>, vector<1x8x128xf32> -> vector<1x8x384xf32>
    %91 = vector.shape_cast %90 : vector<1x8x384xf32> to vector<8x384xf32>
    %cst_31 = arith.constant dense<0.000000e+00> : vector<8x128xf32>
    %92 = tpu.matmul %91, %82, %cst_31 {dimension_numbers = #tpu.dot_dimension_numbers<[1], [0], [0], [1], [0, 0, 1, 1], [], []>} : vector<8x384xf32>, vector<384x128xf32>, vector<8x128xf32> -> vector<8x128xf32>
    %93 = vector.broadcast %83 : vector<1x128xf32> to vector<8x128xf32>
    %94 = arith.addf %92, %93 : vector<8x128xf32>
    %cst_32 = arith.constant 0.000000e+00 : f32
    %95 = vector.broadcast %cst_32 : f32 to vector<8x128xf32>
    %96 = arith.maximumf %94, %95 : vector<8x128xf32>
    %97 = vector.shape_cast %96 : vector<8x128xf32> to vector<1x8x128xf32>
    %c0_33 = arith.constant 0 : index
    %c0_34 = arith.constant 0 : index
    %98 = vector.load %arg10[%c0_33, %c0_34] : memref<384x128xf32, #tpu.memory_space<vmem>>, vector<384x128xf32>
    %c0_35 = arith.constant 0 : index
    %c0_36 = arith.constant 0 : index
    %99 = vector.load %arg11[%c0_35, %c0_36] : memref<1x128xf32, #tpu.memory_space<vmem>>, vector<1x128xf32>
    %100 = vector.extract_strided_slice %97 {offsets = [0, 7, 0], sizes = [1, 1, 128], strides = [1, 1, 1]} : vector<1x8x128xf32> to vector<1x1x128xf32>
    %101 = vector.extract_strided_slice %97 {offsets = [0, 0, 0], sizes = [1, 7, 128], strides = [1, 1, 1]} : vector<1x8x128xf32> to vector<1x7x128xf32>
    %102 = tpu.concatenate %100, %101 in 1 : vector<1x1x128xf32>, vector<1x7x128xf32> -> vector<1x8x128xf32>
    %103 = vector.extract_strided_slice %97 {offsets = [0, 1, 0], sizes = [1, 7, 128], strides = [1, 1, 1]} : vector<1x8x128xf32> to vector<1x7x128xf32>
    %104 = vector.extract_strided_slice %97 {offsets = [0, 0, 0], sizes = [1, 1, 128], strides = [1, 1, 1]} : vector<1x8x128xf32> to vector<1x1x128xf32>
    %105 = tpu.concatenate %103, %104 in 1 : vector<1x7x128xf32>, vector<1x1x128xf32> -> vector<1x8x128xf32>
    %106 = tpu.concatenate %102, %97, %105 in 2 : vector<1x8x128xf32>, vector<1x8x128xf32>, vector<1x8x128xf32> -> vector<1x8x384xf32>
    %107 = vector.shape_cast %106 : vector<1x8x384xf32> to vector<8x384xf32>
    %cst_37 = arith.constant dense<0.000000e+00> : vector<8x128xf32>
    %108 = tpu.matmul %107, %98, %cst_37 {dimension_numbers = #tpu.dot_dimension_numbers<[1], [0], [0], [1], [0, 0, 1, 1], [], []>} : vector<8x384xf32>, vector<384x128xf32>, vector<8x128xf32> -> vector<8x128xf32>
    %109 = vector.broadcast %99 : vector<1x128xf32> to vector<8x128xf32>
    %110 = arith.addf %108, %109 : vector<8x128xf32>
    %cst_38 = arith.constant 0.000000e+00 : f32
    %111 = vector.broadcast %cst_38 : f32 to vector<8x128xf32>
    %112 = arith.maximumf %110, %111 : vector<8x128xf32>
    %113 = vector.shape_cast %112 : vector<8x128xf32> to vector<1x8x128xf32>
    %c0_39 = arith.constant 0 : index
    %c0_40 = arith.constant 0 : index
    %114 = vector.load %arg12[%c0_39, %c0_40] : memref<384x64xf32, #tpu.memory_space<vmem>>, vector<384x64xf32>
    %c0_41 = arith.constant 0 : index
    %c0_42 = arith.constant 0 : index
    %115 = vector.load %arg13[%c0_41, %c0_42] : memref<1x64xf32, #tpu.memory_space<vmem>>, vector<1x64xf32>
    %116 = vector.extract_strided_slice %113 {offsets = [0, 7, 0], sizes = [1, 1, 128], strides = [1, 1, 1]} : vector<1x8x128xf32> to vector<1x1x128xf32>
    %117 = vector.extract_strided_slice %113 {offsets = [0, 0, 0], sizes = [1, 7, 128], strides = [1, 1, 1]} : vector<1x8x128xf32> to vector<1x7x128xf32>
    %118 = tpu.concatenate %116, %117 in 1 : vector<1x1x128xf32>, vector<1x7x128xf32> -> vector<1x8x128xf32>
    %119 = vector.extract_strided_slice %113 {offsets = [0, 1, 0], sizes = [1, 7, 128], strides = [1, 1, 1]} : vector<1x8x128xf32> to vector<1x7x128xf32>
    %120 = vector.extract_strided_slice %113 {offsets = [0, 0, 0], sizes = [1, 1, 128], strides = [1, 1, 1]} : vector<1x8x128xf32> to vector<1x1x128xf32>
    %121 = tpu.concatenate %119, %120 in 1 : vector<1x7x128xf32>, vector<1x1x128xf32> -> vector<1x8x128xf32>
    %122 = tpu.concatenate %118, %113, %121 in 2 : vector<1x8x128xf32>, vector<1x8x128xf32>, vector<1x8x128xf32> -> vector<1x8x384xf32>
    %123 = vector.shape_cast %122 : vector<1x8x384xf32> to vector<8x384xf32>
    %cst_43 = arith.constant dense<0.000000e+00> : vector<8x64xf32>
    %124 = tpu.matmul %123, %114, %cst_43 {dimension_numbers = #tpu.dot_dimension_numbers<[1], [0], [0], [1], [0, 0, 1, 1], [], []>} : vector<8x384xf32>, vector<384x64xf32>, vector<8x64xf32> -> vector<8x64xf32>
    %125 = vector.broadcast %115 : vector<1x64xf32> to vector<8x64xf32>
    %126 = arith.addf %124, %125 : vector<8x64xf32>
    %127 = vector.shape_cast %126 : vector<8x64xf32> to vector<1x8x64xf32>
    %128 = tpu.iota {dimensions = array<i32: 2>} : vector<1x1x64xi32>
    %c8_i32 = arith.constant 8 : i32
    %c0_i32_44 = arith.constant 0 : i32
    %129 = arith.cmpi eq, %c8_i32, %c0_i32_44 : i32
    %c1_i32_45 = arith.constant 1 : i32
    %130 = arith.select %129, %c1_i32_45, %c8_i32 : i32
    %131 = vector.broadcast %130 : i32 to vector<1x1x64xi32>
    %132 = arith.remsi %128, %131 : vector<1x1x64xi32>
    %c0_i32_46 = arith.constant 0 : i32
    %133 = vector.broadcast %c0_i32_46 : i32 to vector<1x1x64xi32>
    %134 = arith.cmpi ne, %132, %133 : vector<1x1x64xi32>
    %c0_i32_47 = arith.constant 0 : i32
    %135 = vector.broadcast %c0_i32_47 : i32 to vector<1x1x64xi32>
    %136 = arith.cmpi slt, %132, %135 : vector<1x1x64xi32>
    %c0_i32_48 = arith.constant 0 : i32
    %137 = arith.cmpi slt, %130, %c0_i32_48 : i32
    %138 = vector.broadcast %137 : i1 to vector<1x1x64xi1>
    %139 = vector.broadcast %138 : vector<1x1x64xi1> to vector<1x1x64xi1>
    %140 = arith.xori %136, %139 : vector<1x1x64xi1>
    %141 = arith.andi %140, %134 : vector<1x1x64xi1>
    %142 = vector.broadcast %130 : i32 to vector<1x1x64xi32>
    %143 = arith.addi %132, %142 : vector<1x1x64xi32>
    %144 = arith.select %141, %143, %132 : vector<1x1x64xi1>, vector<1x1x64xi32>
    %c4_i32 = arith.constant 4 : i32
    %145 = vector.broadcast %c4_i32 : i32 to vector<1x1x64xi32>
    %146 = arith.cmpi sge, %144, %145 : vector<1x1x64xi32>
    %147 = arith.extui %146 : vector<1x1x64xi1> to vector<1x1x64xi32>
    %148 = arith.sitofp %147 : vector<1x1x64xi32> to vector<1x1x64xf32>
    %149 = vector.broadcast %33 : vector<1x1x1xf32> to vector<1x1x64xf32>
    %150 = arith.mulf %149, %148 : vector<1x1x64xf32>
    %151 = vector.broadcast %150 : vector<1x1x64xf32> to vector<1x8x64xf32>
    %152 = arith.addf %127, %151 : vector<1x8x64xf32>
    %c0_49 = arith.constant 0 : index
    %c0_50 = arith.constant 0 : index
    %c0_51 = arith.constant 0 : index
    %153 = vector.load %arg14[%c0_49, %c0_50, %c0_51] : memref<1x8x64xf32, #tpu.memory_space<vmem>>, vector<1x8x64xf32>
    tpu.vector_store %arg14[%c0_49, %c0_50, %c0_51], %152 {strides = array<i32>} : memref<1x8x64xf32, #tpu.memory_space<vmem>>, vector<1x8x64xf32>,
    return
  }
  func.func @transform_0(%arg0: i32) -> (i32, i32, i32) {
    %c0_i32 = arith.constant 0 : i32
    %c0_i32_0 = arith.constant 0 : i32
    %c0_i32_1 = arith.constant 0 : i32
    return %arg0, %c0_i32, %c0_i32_0 : i32, i32, i32
  }
  func.func @transform_1(%arg0: i32) -> (i32, i32) {
    %c0_i32 = arith.constant 0 : i32
    %c0_i32_0 = arith.constant 0 : i32
    %c0_i32_1 = arith.constant 0 : i32
    return %c0_i32, %c0_i32_0 : i32, i32
  }
  func.func @transform_2(%arg0: i32) -> (i32, i32) {
    %c0_i32 = arith.constant 0 : i32
    %c0_i32_0 = arith.constant 0 : i32
    %c0_i32_1 = arith.constant 0 : i32
    return %c0_i32, %c0_i32_0 : i32, i32
  }
  func.func @transform_3(%arg0: i32) -> (i32, i32) {
    %c0_i32 = arith.constant 0 : i32
    %c0_i32_0 = arith.constant 0 : i32
    %c0_i32_1 = arith.constant 0 : i32
    return %c0_i32, %c0_i32_0 : i32, i32
  }
  func.func @transform_4(%arg0: i32) -> (i32, i32) {
    %c0_i32 = arith.constant 0 : i32
    %c0_i32_0 = arith.constant 0 : i32
    %c0_i32_1 = arith.constant 0 : i32
    return %c0_i32, %c0_i32_0 : i32, i32
  }
  func.func @transform_5(%arg0: i32) -> (i32, i32) {
    %c0_i32 = arith.constant 0 : i32
    %c0_i32_0 = arith.constant 0 : i32
    %c0_i32_1 = arith.constant 0 : i32
    return %c0_i32, %c0_i32_0 : i32, i32
  }
  func.func @transform_6(%arg0: i32) -> (i32, i32) {
    %c0_i32 = arith.constant 0 : i32
    %c0_i32_0 = arith.constant 0 : i32
    %c0_i32_1 = arith.constant 0 : i32
    return %c0_i32, %c0_i32_0 : i32, i32
  }
  func.func @transform_7(%arg0: i32) -> (i32, i32) {
    %c0_i32 = arith.constant 0 : i32
    %c0_i32_0 = arith.constant 0 : i32
    %c0_i32_1 = arith.constant 0 : i32
    return %c0_i32, %c0_i32_0 : i32, i32
  }
  func.func @transform_8(%arg0: i32) -> (i32, i32) {
    %c0_i32 = arith.constant 0 : i32
    %c0_i32_0 = arith.constant 0 : i32
    %c0_i32_1 = arith.constant 0 : i32
    return %c0_i32, %c0_i32_0 : i32, i32
  }
  func.func @transform_9(%arg0: i32) -> (i32, i32) {
    %c0_i32 = arith.constant 0 : i32
    %c0_i32_0 = arith.constant 0 : i32
    %c0_i32_1 = arith.constant 0 : i32
    return %c0_i32, %c0_i32_0 : i32, i32
  }
  func.func @transform_10(%arg0: i32) -> (i32, i32) {
    %c0_i32 = arith.constant 0 : i32
    %c0_i32_0 = arith.constant 0 : i32
    %c0_i32_1 = arith.constant 0 : i32
    return %c0_i32, %c0_i32_0 : i32, i32
  }
  func.func @transform_11(%arg0: i32) -> (i32, i32) {
    %c0_i32 = arith.constant 0 : i32
    %c0_i32_0 = arith.constant 0 : i32
    %c0_i32_1 = arith.constant 0 : i32
    return %c0_i32, %c0_i32_0 : i32, i32
  }
  func.func @transform_12(%arg0: i32) -> (i32, i32) {
    %c0_i32 = arith.constant 0 : i32
    %c0_i32_0 = arith.constant 0 : i32
    %c0_i32_1 = arith.constant 0 : i32
    return %c0_i32, %c0_i32_0 : i32, i32
  }
  func.func @transform_13(%arg0: i32) -> (i32, i32, i32) {
    %c0_i32 = arith.constant 0 : i32
    %c0_i32_0 = arith.constant 0 : i32
    %c0_i32_1 = arith.constant 0 : i32
    return %arg0, %c0_i32, %c0_i32_0 : i32, i32, i32
  }
}

</mosaic_0001>

<bundles_post_ra>
// kernel: tpu_custom_call.1
= control target key start
LH: loop header
LB: loop body
LE: loop exit
PB: predicated region body
PF: predicated region fallthrough
CT: control target
= control target key end

     0   :  { %18 = vsyncpa [#allocation3], 0  ;;  %s3103_s0 = inlined_call_operand.vmem [shape: f32[2,8,8], index: 0, kind: input, shape index: {}]   ;;  %s3104_s1 = inlined_call_operand.vmem [shape: f32[24,128], index: 1, kind: input, shape index: {}]   ;;  %s3105_s2 = inlined_call_operand.vmem [shape: f32[1,128], index: 2, kind: input, shape index: {}]   ;;  %s3106_s3 = inlined_call_operand.vmem [shape: f32[384,128], index: 3, kind: input, shape index: {}]   ;;  %s3107_s4 = inlined_call_operand.vmem [shape: f32[1,128], index: 4, kind: input, shape index: {}]   ;;  %s3108_s5 = inlined_call_operand.hbm [shape: f32[384,128], index: 5, kind: input, shape index: {}]   ;;  %s3109_s6 = inlined_call_operand.vmem [shape: f32[1,128], index: 6, kind: input, shape index: {}]   ;;  %s3110_s7 = inlined_call_operand.hbm [shape: f32[384,128], index: 7, kind: input, shape index: {}]   ;;  %s3111_s8 = inlined_call_operand.vmem [shape: f32[1,128], index: 8, kind: input, shape index: {}]   ;;  %s3112_s9 = inlined_call_operand.hbm [shape: f32[384,128], index: 9, kind: input, shape index: {}]   ;;  %s3113_s10 = inlined_call_operand.vmem [shape: f32[1,128], index: 10, kind: input, shape index: {}]   ;;  %s3114_s11 = inlined_call_operand.vmem [shape: f32[384,64], index: 11, kind: input, shape index: {}]   ;;  %s3115_s12 = inlined_call_operand.vmem [shape: f32[1,64], index: 12, kind: input, shape index: {}]   ;;  %s3116_s13 = inlined_call_operand.hbm [shape: f32[2,8,64], index: 13, kind: output, shape index: {}]  }
   0x1   :  { %19 = vsyncpa [#allocation6], 0 }
   0x2   :  { %20 = vsyncpa [#allocation4], 0 }
   0x3   :  { %22 = vsyncpa [#allocation4 + $0x1], 0  ;;  %s2544_s25 = smov 0   ;;  %s2546_s26 = smov 0  }
   0x4   :  { %s2548_s27 = smov 0   ;;  %s2550_s28 = smov 0  }
   0x5 LB: > { %3123 = sst [smem:[#allocation12_spill]] %s2458_s27  ;;  %s2565_s29 = sadd.s32 4294967295, %s2462_s28   ;;  %s2462_s28 = sphi %s2550_s28, %s3138_s28   ;;  %s2458_s27 = sphi %s2548_s27, %s3140_s27   ;;  %s2454_s26 = sphi %s2546_s26, %s3142_s26   ;;  %s2450_s25 = sphi %s2544_s25, %s3141_s25  }
   0x6   : > { %s1766_s30 = sadd.s32 4294967294, %s2462_s28   ;;  %s2569_s14 = sadd.s32 1, %s2462_s28  }
   0x7   : > { %3124 = sst [smem:[#allocation13_spill]] %s2569_s14  ;;  %s313_s15 = sadd.s32 1, %s2458_s27 }
   0x8   : > { %s310_s16 = ssub.s32 %s2462_s28, %s2569_s14  ;;  %p323_p0 = scmp.ne.s32.totalorder %s2458_s27, %s2454_s26 }
   0x9   : > { %p311_p1 = scmp.eq.s32.totalorder %s310_s16, 0  ;;  %p324_p2 = scmp.eq.s32.totalorder %s2565_s29, 1 }
   0xa   : > { %p329_p3 = scmp.ne.s32.totalorder %s2454_s26, %s2450_s25  ;;  %p330_p4 = scmp.eq.s32.totalorder %s1766_s30, 1 }
   0xb   : > { %s2580_s17 = scalar_select %p311_p1, %s2458_s27, %s313_s15  }
   0xc   : > { %p2582_p5 = por %p324_p2, %p323_p0  ;;  %p2586_p6 = por %p330_p4, %p329_p3 }
   0xd   : > { %3125 = sst [smem:[#allocation14_spill]] %s2580_s17  ;;  %p1767_p7 = scmp.ge.s32.totalorder %s2462_s28, 1 }
   0xe   : > { %s3126_s18 = scalar_select %p2582_p5, 1, 0 }
   0xf   : > { %s3127_s19 = scalar_select %p2586_p6, 1, 0 }
  0x10   : > { %p337_p8 = scmp.lt.s32.totalorder %s2462_s28, 3  ;;  %p3120_p9 = scmp.eq.s32.totalorder %s2565_s29, 0 }
  0x11   : > { %3128 = sst [smem:[#allocation15_spill]] %s3127_s19  ;;  %s2464_s21 = smov [#allocation5]  }
  0x12   : > { %p2593_p10 = pnand %p1767_p7, %p337_p8  ;;  %s377_s22 = sshll.u32 %s2464_s21, 4  ;;  %s378_s22 = int_to_ptr.vmem [resolvable:$true] %s377_s22 }
  0x13   : > { %s2465_s24 = smov [#allocation2]   ;;  %s2466_s15 = smov [#allocation7]  }
  0x14   : > { %p2253_p11 = pneg %p2593_p10  ;;  %s361_s30 = sshll.u32 %s2465_s24, 4  ;;  %s362_s30 = int_to_ptr.vmem [resolvable:$true] %s361_s30 }
  0x15   : > { %s393_s16 = sshll.u32 %s2466_s15, 4  ;;  %s2327_s17 = scalar_lea.vmem %s378_s22, 6144  ;;  %s394_s16 = int_to_ptr.vmem [resolvable:$true] %s393_s16 }
  0x16   : > { %p2601_p12 = pnand %p3120_p9, %p2253_p11  ;;  %p2328_p0 = scmp.ne.s32.totalorder %s378_s22, %s2327_s17 }
  0x17   : > { %p2335_p3 = scmp.lt.s32.totalorder %s378_s22, %s378_s22  ;;  %p2336_p4 = scmp.lt.s32.totalorder %s2327_s17, %s2327_s17 }
  0x18   : > { %p2318_p13 = pneg %p2601_p12 }
  0x19   : > { %p2337_p7 = por %p2336_p4, %p2335_p3 }
  0x1a   : > { %p2330_p1 = pnand %p2328_p0, %p2318_p13 }
  0x1c   : > { %p2331_p2 = pneg %p2330_p1 }
  0x1e   : > { %p2338_p8 = pnand %p2337_p7, %p2331_p2 }
  0x20   : > { %2341 = shalt.err (!%p2338_p8)
}
  0x21   : > { %s2467_s21 = smov 128   ;;  %s2468_s24 = smov 8  }
  0x22   : > { %2259 = dma.hbm_to_vmem [thread:$0]  (!%p2601_p12), %s3110_s7, 6144, %s378_s22, [#allocation6], %s2467_s21, %s2467_s21, %s2468_s24  }
  0x23   : > { %s2353_s14 = scalar_lea.vmem %s362_s30, 6144  ;;  %p2361_p9 = scmp.lt.s32.totalorder %s362_s30, %s362_s30 }
  0x24   : > { %p2354_p11 = scmp.ne.s32.totalorder %s362_s30, %s2353_s14  ;;  %p2362_p6 = scmp.lt.s32.totalorder %s2353_s14, %s2353_s14 }
  0x26   : > { %p2356_p0 = pnand %p2354_p11, %p2318_p13  ;;  %p2363_p3 = por %p2362_p6, %p2361_p9 }
  0x28   : > { %p2357_p1 = pneg %p2356_p0 }
  0x2a   : > { %p2364_p2 = pnand %p2363_p3, %p2357_p1 }
  0x2c   : > { %2367 = shalt.err (!%p2364_p2)
}
  0x2d   : > { %2256 = dma.hbm_to_vmem [thread:$0]  (!%p2601_p12), %s3108_s5, 6144, %s362_s30, [#allocation3], %s2467_s21, %s2467_s21, %s2468_s24  }
  0x2e   : > { %s2379_s27 = scalar_lea.vmem %s394_s16, 6144  ;;  %p2387_p11 = scmp.lt.s32.totalorder %s394_s16, %s394_s16 }
  0x2f   : > { %p2380_p4 = scmp.ne.s32.totalorder %s394_s16, %s2379_s27  ;;  %p2388_p0 = scmp.lt.s32.totalorder %s2379_s27, %s2379_s27 }
  0x31   : > { %p2382_p7 = pnand %p2380_p4, %p2318_p13  ;;  %p2389_p5 = por %p2388_p0, %p2387_p11 }
  0x33   : > { %p2383_p8 = pneg %p2382_p7 }
  0x35   : > { %p2390_p6 = pnand %p2389_p5, %p2383_p8 }
  0x37   : > { %2393 = shalt.err (!%p2390_p6)
}
  0x38   : > { %2262 = dma.hbm_to_vmem [thread:$0]  (!%p2601_p12), %s3112_s9, 6144, %s394_s16, [#allocation6], %s2467_s21, %s2467_s21, %s2468_s24  }
  0x39   : > { %425 = sbr.rel (%p2593_p10) target bundleno = 1428 (0x594), region = 72  ;;  %p3131_p9 = scmp.eq.s32.totalorder (!%p2593_p10), %s2565_s29, 0 }
  0x3e   : > { %2437 = dma.done.wait (%p3131_p9), [#allocation3], 6144   ;;  %p3132_p13 = pmov %p3131_p9 }
  0x3f   : > { %p3133_p1 = pmov %p3131_p9 }
  0x40   : > { %2439 = vsyncadd (%p3132_p13), [#allocation3], 4294961152 }
  0x41   : > { %2441 = dma.done.wait (%p3133_p1), [#allocation6], 12288   ;;  %p3134_p5 = pmov %p3133_p1 }
  0x42   : > { %p476_p3 = scmp.lt.s32.totalorder %s2565_s29, 1  ;;  %v2469_v0 = vmov 0.0   ;;  %vm2470_vm0 = vmmov 0   ;;  %v527_v2 = vld [vmem:[%s3104_s1 + $0x10] sm:$0xff]  ;;  %v526_v3 = vld [vmem:[%s3104_s1 + $0x8] sm:$0xff]  ;;  %s2471_s27 = smov 8  }
  0x43   : > { %2443 = vsyncadd (%p3134_p5), [#allocation6], 4294955008  ;;  %2055 = vmatprep.subr.mxu0 %v2469_v0  ;;  %2061 = vmatprep.mubr.msk.f32.mxu0 %vm2470_vm0, %v2469_v0  ;;  %v660_v5 = vld [vmem:[%s3106_s3 + $0xf8] sm:$0xff]  ;;  %v525_v7 = vld [vmem:[%s3104_s1] sm:$0xff]  ;;  %s2472_s22 = smov 16   ;;  %vm502_vm1 = vcmask 64512  }
  0x44   : > { %s477_s19 = scalar_select %p476_p3, %s2565_s29, 1  ;;  %2056 = vmatpush3.msra.mxu0 %v527_v2  ;;  %v644_v6 = vld [vmem:[%s3106_s3 + $0x78] sm:$0xff]  ;;  %1795 = vmatprep.subr.mxu1 %v660_v5  ;;  %v659_v8 = vld [vmem:[%s3106_s3 + $0xf0] sm:$0xff]  ;;  %v658_v10 = vld [vmem:[%s3106_s3 + $0xe8] sm:$0xff]  ;;  %vm546_vm2 = vcmask 130048   ;;  %vm554_vm3 = vcmask 195584  }
  0x45   : > { %2057 = vmatprep.subr.mxu0 %v2469_v0  ;;  %1796 = vmatpush3.msra.mxu1 %v644_v6  ;;  %v643_v9 = vld [vmem:[%s3106_s3 + $0x70] sm:$0xff]  ;;  %v642_v11 = vld [vmem:[%s3106_s3 + $0x68] sm:$0xff]  ;;  %v657_v12 = vld [vmem:[%s3106_s3 + $0xe0] sm:$0xff]  ;;  %vm1660_vm7 = vcmask 523264   ;;  %p3135_p12 = scmp.ne.s32.totalorder %s3126_s18, 0  ;;  %s2473_s15 = smov [#allocation8]  }
  0x46   : > { %s1777_s20 = sshll.u32 %s477_s19, 3  ;;  %2058 = vmatpush3.msra.mxu0 %v526_v3  ;;  %1797 = vmatprep.subr.mxu1 %v659_v8  ;;  %v641_v13 = vld [vmem:[%s3106_s3 + $0x60] sm:$0xff]  ;;  %v656_v14 = vld [vmem:[%s3106_s3 + $0xd8] sm:$0xff]  ;;  %v655_v16 = vld [vmem:[%s3106_s3 + $0xd0] sm:$0xff] }
  0x47   : > { %s2649_s16 = scalar_lea.vmem %s3103_s0, %s1777_s20  ;;  %2059 = vmatprep.subr.mxu0 %v2469_v0  ;;  %1798 = vmatpush3.msra.mxu1 %v643_v9  ;;  %v640_v15 = vld [vmem:[%s3106_s3 + $0x58] sm:$0xff]  ;;  %v639_v17 = vld [vmem:[%s3106_s3 + $0x50] sm:$0xff]  ;;  %v654_v18 = vld [vmem:[%s3106_s3 + $0xc8] sm:$0xff] }
  0x48   : > { %v2652_v1 = vld [vmem:[%s2649_s16] sm:$0xff]  ;;  %2060 = vmatpush3.msra.mxu0 %v525_v7  ;;  %1799 = vmatprep.subr.mxu1 %v658_v10  ;;  %v638_v19 = vld [vmem:[%s3106_s3 + $0x48] sm:$0xff]  ;;  %v652_v22 = vld [vmem:[%s3106_s3 + $0xb8] sm:$0xff] }
  0x49   : > { %538 = vrot.lane.b32.xlu0 %v2652_v1, %s2471_s27  ;;  %v534_v4 = vrot.slane %v2652_v1, 1  ;;  %2064 = vmatprep.subr.mxu0 %v2469_v0  ;;  %v653_v20 = vld [vmem:[%s3106_s3 + $0xc0] sm:$0xff]  ;;  %v636_v23 = vld [vmem:[%s3106_s3 + $0x38] sm:$0xff]  ;;  %v651_v24 = vld [vmem:[%s3106_s3 + $0xb0] sm:$0xff]  ;;  %v530_v32 = vrot.slane %v2652_v1, 7  ;;  %s1788_s27 = sshll.u32 %s2565_s29, 7 }
  0x4a   : > { %1800 = vmatpush3.msra.mxu1 %v642_v11  ;;  %v637_v21 = vld [vmem:[%s3106_s3 + $0x40] sm:$0xff]  ;;  %v635_v25 = vld [vmem:[%s3106_s3 + $0x30] sm:$0xff]  ;;  %v650_v26 = vld [vmem:[%s3106_s3 + $0xa8] sm:$0xff]  ;;  %s1674_s23 = scalar_lea.hbm %s3116_s13, %s1788_s27  ;;  %s2398_s29 = sshll.u32 %s2473_s15, 4  ;;  %s2399_s29 = int_to_ptr.vmem [resolvable:$false] %s2398_s29 }
  0x4b   : > { %1801 = vmatprep.subr.mxu1 %v657_v12  ;;  %v634_v27 = vld [vmem:[%s3106_s3 + $0x28] sm:$0xff]  ;;  %v649_v28 = vld [vmem:[%s3106_s3 + $0xa0] sm:$0xff]  ;;  %v648_v30 = vld [vmem:[%s3106_s3 + $0x98] sm:$0xff] }
  0x4c   : > { %1802 = vmatpush3.msra.mxu1 %v641_v13  ;;  %v633_v29 = vld [vmem:[%s3106_s3 + $0x20] sm:$0xff]  ;;  %v676_v35 = vld [vmem:[%s3106_s3 + $0x178] sm:$0xff]  ;;  %v675_v37 = vld [vmem:[%s3106_s3 + $0x170] sm:$0xff] }
  0x4d   : > { %542 = vrot.lane.b32.xlu0 %v534_v4, %s2472_s22  ;;  %1803 = vmatprep.subr.mxu1 %v656_v14  ;;  %v674_v38 = vld [vmem:[%s3106_s3 + $0x168] sm:$0xff]  ;;  %v673_v39 = vld [vmem:[%s3106_s3 + $0x160] sm:$0xff]  ;;  %v672_v40 = vld [vmem:[%s3106_s3 + $0x158] sm:$0xff] }
  0x4e   : > { %1804 = vmatpush3.msra.mxu1 %v640_v15  ;;  %v671_v41 = vld [vmem:[%s3106_s3 + $0x150] sm:$0xff]  ;;  %v670_v42 = vld [vmem:[%s3106_s3 + $0x148] sm:$0xff]  ;;  %v669_v43 = vld [vmem:[%s3106_s3 + $0x140] sm:$0xff] }
  0x4f   : > { %1805 = vmatprep.subr.mxu1 %v655_v16  ;;  %v668_v44 = vld [vmem:[%s3106_s3 + $0x138] sm:$0xff]  ;;  %v667_v45 = vld [vmem:[%s3106_s3 + $0x130] sm:$0xff]  ;;  %v666_v46 = vld [vmem:[%s3106_s3 + $0x128] sm:$0xff] }
  0x50   : > { %1806 = vmatpush3.msra.mxu1 %v639_v17  ;;  %v665_v47 = vld [vmem:[%s3106_s3 + $0x120] sm:$0xff]  ;;  %v632_v48 = vld [vmem:[%s3106_s3 + $0x18] sm:$0xff]  ;;  %v647_v50 = vld [vmem:[%s3106_s3 + $0x90] sm:$0xff] }
  0x51   : > { %1807 = vmatprep.subr.mxu1 %v654_v18  ;;  %v664_v49 = vld [vmem:[%s3106_s3 + $0x118] sm:$0xff]  ;;  %v631_v51 = vld [vmem:[%s3106_s3 + $0x10] sm:$0xff]  ;;  %v646_v53 = vld [vmem:[%s3106_s3 + $0x88] sm:$0xff] }
  0x52   : > { %1808 = vmatpush3.msra.mxu1 %v638_v19  ;;  %v663_v52 = vld [vmem:[%s3106_s3 + $0x110] sm:$0xff]  ;;  %v630_v54 = vld [vmem:[%s3106_s3 + $0x8] sm:$0xff]  ;;  %v645_v56 = vld [vmem:[%s3106_s3 + $0x80] sm:$0xff] }
  0x53   : > { %1809 = vmatprep.subr.mxu1 %v653_v20  ;;  %v662_v55 = vld [vmem:[%s3106_s3 + $0x108] sm:$0xff]  ;;  %v629_v57 = vld [vmem:[%s3106_s3] sm:$0xff]  ;;  %v863_v59 = vld [vmem:[#allocation2 + $0xf8] sm:$0xff] }
  0x54   : > { %1810 = vmatpush3.msra.mxu1 %v637_v21  ;;  %v661_v58 = vld [vmem:[%s3106_s3 + $0x100] sm:$0xff]  ;;  %v847_v4 = vld [vmem:[#allocation2 + $0x78] sm:$0xff]  ;;  %v862_v6 = vld [vmem:[#allocation2 + $0xf0] sm:$0xff] }
  0x55   : > { %1811 = vmatprep.subr.mxu1 %v652_v22  ;;  %v1779_v60 = vld [vmem:[%s3105_s2] ss:$0 sm:$0xff]  ;;  %v879_v5 = vld [vmem:[#allocation2 + $0x178] sm:$0xff]  ;;  %v846_v7 = vld [vmem:[#allocation2 + $0x70] sm:$0xff] }
  0x56   : > { %1812 = vmatpush3.msra.mxu1 %v636_v23  ;;  %v878_v8 = vld [vmem:[#allocation2 + $0x170] sm:$0xff]  ;;  %v861_v9 = vld [vmem:[#allocation2 + $0xe8] sm:$0xff]  ;;  %v860_v12 = vld [vmem:[#allocation2 + $0xe0] sm:$0xff] }
  0x57   : > { %1813 = vmatprep.subr.mxu1 %v651_v24  ;;  %v845_v10 = vld [vmem:[#allocation2 + $0x68] sm:$0xff]  ;;  %v844_v13 = vld [vmem:[#allocation2 + $0x60] sm:$0xff]  ;;  %v859_v15 = vld [vmem:[#allocation2 + $0xd8] sm:$0xff] }
  0x58   : > { %1814 = vmatpush3.msra.mxu1 %v635_v25  ;;  %v877_v11 = vld [vmem:[#allocation2 + $0x168] sm:$0xff]  ;;  %v876_v14 = vld [vmem:[#allocation2 + $0x160] sm:$0xff]  ;;  %v843_v16 = vld [vmem:[#allocation2 + $0x58] sm:$0xff] }
  0x59   : > { %1815 = vmatprep.subr.mxu1 %v650_v26  ;;  %v875_v17 = vld [vmem:[#allocation2 + $0x158] sm:$0xff]  ;;  %v858_v18 = vld [vmem:[#allocation2 + $0xd0] sm:$0xff]  ;;  %v857_v21 = vld [vmem:[#allocation2 + $0xc8] sm:$0xff] }
  0x5a   : > { %1816 = vmatpush3.msra.mxu1 %v634_v27  ;;  %v842_v19 = vld [vmem:[#allocation2 + $0x50] sm:$0xff]  ;;  %v841_v22 = vld [vmem:[#allocation2 + $0x48] sm:$0xff]  ;;  %v856_v24 = vld [vmem:[#allocation2 + $0xc0] sm:$0xff] }
  0x5b   : > { %1817 = vmatprep.subr.mxu1 %v649_v28  ;;  %v874_v20 = vld [vmem:[#allocation2 + $0x150] sm:$0xff]  ;;  %v873_v23 = vld [vmem:[#allocation2 + $0x148] sm:$0xff]  ;;  %v840_v25 = vld [vmem:[#allocation2 + $0x40] sm:$0xff] }
  0x5c   : > { %1818 = vmatpush3.msra.mxu1 %v633_v29  ;;  %v872_v26 = vld [vmem:[#allocation2 + $0x140] sm:$0xff]  ;;  %v855_v27 = vld [vmem:[#allocation2 + $0xb8] sm:$0xff] }
  0x5d   : > { %1819 = vmatprep.subr.mxu1 %v648_v30  ;;  %v839_v28 = vld [vmem:[#allocation2 + $0x38] sm:$0xff]  ;;  %v854_v30 = vld [vmem:[#allocation2 + $0xb0] sm:$0xff] }
  0x5e   : > { %1820 = vmatpush3.msra.mxu1 %v632_v48  ;;  %v871_v29 = vld [vmem:[#allocation2 + $0x138] sm:$0xff]  ;;  %v848_v48 = vld [vmem:[#allocation2 + $0x80] sm:$0xff] }
  0x5f   : > { %1821 = vmatprep.subr.mxu1 %v647_v50  ;;  %v864_v50 = vld [vmem:[#allocation2 + $0x100] sm:$0xff] }
  0x60   : > { %1822 = vmatpush3.msra.mxu1 %v631_v51  ;;  %v1066_v51 = vld [vmem:[#allocation5 + $0xf8] sm:$0xff] }
  0x61   : > { %1823 = vmatprep.subr.mxu1 %v646_v53 }
  0x62   : > { %1824 = vmatpush3.msra.mxu1 %v630_v54  ;;  %v1781_v54 = vld [vmem:[%s3107_s4] ss:$0 sm:$0xff] }
  0x63   : > { %1825 = vmatprep.subr.mxu1 %v645_v56 }
  0x64   : > { %1826 = vmatpush3.msra.mxu1 %v629_v57 }
  0x65   : > { %1847 = vmatprep.subr.mxu1 %v863_v59 }
  0xbb   : > { %v539_v31 = vpop.permute.xlu0 %538 }
  0xbc   : > { %v545_v33 = vsel %vm502_vm1, %v530_v32, %v539_v31  ;;  %v838_v31 = vld [vmem:[#allocation2 + $0x30] sm:$0xff] }
  0xbd   : > { %v870_v32 = vld [vmem:[#allocation2 + $0x130] sm:$0xff] }
  0xbf   : > { %v543_v34 = vpop.permute.xlu0 %542 }
  0xc0   : > { %v547_v36 = vsel %vm546_vm2, %v545_v33, %v543_v34  ;;  %v853_v33 = vld [vmem:[#allocation2 + $0xa8] sm:$0xff] }
  0xc1   : > { %2062 = vmatmul.mubr.msk.f32.vlgmr.msra.gmra.mxu0 %vm554_vm3, %v547_v36  ;;  %v837_v34 = vld [vmem:[#allocation2 + $0x28] sm:$0xff]  ;;  %v852_v36 = vld [vmem:[#allocation2 + $0xa0] sm:$0xff] }
  0xc2   : > { %2065 = vmatpush3.msra.mxu0 %v676_v35  ;;  %2096 = vmatprep.mubr.msk.f32.mxu0 %vm2470_vm0, %v2469_v0  ;;  %v869_v35 = vld [vmem:[#allocation2 + $0x128] sm:$0xff] }
  0xc3   : > { %2066 = vmatprep.subr.mxu0 %v2469_v0 }
  0xc4   : > { %2067 = vmatpush3.msra.mxu0 %v675_v37  ;;  %v836_v37 = vld [vmem:[#allocation2 + $0x20] sm:$0xff] }
  0xc5   : > { %2068 = vmatprep.subr.mxu0 %v2469_v0 }
  0xc6   : > { %2069 = vmatpush3.msra.mxu0 %v674_v38  ;;  %v868_v38 = vld [vmem:[#allocation2 + $0x120] sm:$0xff] }
  0xc7   : > { %2070 = vmatprep.subr.mxu0 %v2469_v0 }
  0xc8   : > { %2071 = vmatpush3.msra.mxu0 %v673_v39  ;;  %v851_v39 = vld [vmem:[#allocation2 + $0x98] sm:$0xff] }
  0xc9   : > { %2072 = vmatprep.subr.mxu0 %v2469_v0 }
  0xca   : > { %2073 = vmatpush3.msra.mxu0 %v672_v40  ;;  %v835_v40 = vld [vmem:[#allocation2 + $0x18] sm:$0xff] }
  0xcb   : > { %2074 = vmatprep.subr.mxu0 %v2469_v0 }
  0xcc   : > { %2075 = vmatpush3.msra.mxu0 %v671_v41  ;;  %v867_v41 = vld [vmem:[#allocation2 + $0x118] sm:$0xff] }
  0xcd   : > { %2076 = vmatprep.subr.mxu0 %v2469_v0 }
  0xce   : > { %2077 = vmatpush3.msra.mxu0 %v670_v42  ;;  %v850_v42 = vld [vmem:[#allocation2 + $0x90] sm:$0xff] }
  0xcf   : > { %2078 = vmatprep.subr.mxu0 %v2469_v0 }
  0xd0   : > { %2079 = vmatpush3.msra.mxu0 %v669_v43  ;;  %v834_v43 = vld [vmem:[#allocation2 + $0x10] sm:$0xff] }
  0xd1   : > { %2080 = vmatprep.subr.mxu0 %v2469_v0 }
  0xd2   : > { %2081 = vmatpush3.msra.mxu0 %v668_v44  ;;  %v866_v44 = vld [vmem:[#allocation2 + $0x110] sm:$0xff] }
  0xd3   : > { %2082 = vmatprep.subr.mxu0 %v2469_v0 }
  0xd4   : > { %2083 = vmatpush3.msra.mxu0 %v667_v45  ;;  %v849_v45 = vld [vmem:[#allocation2 + $0x88] sm:$0xff] }
  0xd5   : > { %2084 = vmatprep.subr.mxu0 %v2469_v0 }
  0xd6   : > { %2085 = vmatpush3.msra.mxu0 %v666_v46  ;;  %v833_v46 = vld [vmem:[#allocation2 + $0x8] sm:$0xff] }
  0xd7   : > { %2086 = vmatprep.subr.mxu0 %v2469_v0 }
  0xd8   : > { %2087 = vmatpush3.msra.mxu0 %v665_v47  ;;  %v865_v47 = vld [vmem:[#allocation2 + $0x108] sm:$0xff] }
  0xd9   : > { %2088 = vmatprep.subr.mxu0 %v2469_v0 }
  0xda   : > { %2089 = vmatpush3.msra.mxu0 %v664_v49  ;;  %v832_v49 = vld [vmem:[#allocation2] sm:$0xff] }
  0xdb   : > { %2090 = vmatprep.subr.mxu0 %v2469_v0 }
  0xdc   : > { %2091 = vmatpush3.msra.mxu0 %v663_v52 }
  0xdd   : > { %2092 = vmatprep.subr.mxu0 %v2469_v0 }
  0xde   : > { %2093 = vmatpush3.msra.mxu0 %v662_v55 }
  0xdf   : > { %2094 = vmatprep.subr.mxu0 %v2469_v0 }
  0xe0   : > { %2095 = vmatpush3.msra.mxu0 %v661_v58 }
  0xe1   : > { %2099 = vmatprep.subr.mxu0 %v2469_v0 }
 0x181   : > { %v624_v61 = vpop.f32.mrf.mxu0 }
 0x182   : > { %v625_v62 = vadd.f32 %v1779_v60, %v624_v61 }
 0x183   : > { %v2063_v63 = vpop.f32.mrf.mxu0 }
 0x184   : > { %v628_v1 = vmax.f32 %v625_v62, 0.0  ;;  %v1050_v63 = vld [vmem:[#allocation5 + $0x78] sm:$0xff] }
 0x186   : > { %v682_v2 = vrot.slane %v628_v1, 1  ;;  %755 = vmatprep.mubr.f32.mxu1 %v628_v1  ;;  %v679_v3 = vrot.slane %v628_v1, 7  ;;  %v1082_v1 = vld [vmem:[#allocation5 + $0x178] sm:$0xff] }
 0x188   : > { %756 = vmatmul.mubr.f32.vlgmr.msra.gmra.mxu1 %v679_v3  ;;  %2097 = vmatmul.mubr.f32.vlgmr.msra.gmra.mxu0 %v682_v2  ;;  %v1065_v2 = vld [vmem:[#allocation5 + $0xf0] sm:$0xff] }
 0x189   : > { %1848 = vmatpush3.msra.mxu1 %v847_v4  ;;  %2100 = vmatpush3.msra.mxu0 %v879_v5  ;;  %v1049_v3 = vld [vmem:[#allocation5 + $0x70] sm:$0xff]  ;;  %v1064_v5 = vld [vmem:[#allocation5 + $0xe8] sm:$0xff] }
 0x18a   : > { %1849 = vmatprep.subr.mxu1 %v862_v6  ;;  %2101 = vmatprep.subr.mxu0 %v2469_v0  ;;  %v1081_v4 = vld [vmem:[#allocation5 + $0x170] sm:$0xff]  ;;  %v1048_v6 = vld [vmem:[#allocation5 + $0x68] sm:$0xff] }
 0x18b   : > { %1850 = vmatpush3.msra.mxu1 %v846_v7  ;;  %2102 = vmatpush3.msra.mxu0 %v878_v8  ;;  %v1080_v7 = vld [vmem:[#allocation5 + $0x168] sm:$0xff]  ;;  %v1063_v8 = vld [vmem:[#allocation5 + $0xe0] sm:$0xff] }
 0x18c   : > { %1851 = vmatprep.subr.mxu1 %v861_v9  ;;  %2103 = vmatprep.subr.mxu0 %v2469_v0  ;;  %v1047_v9 = vld [vmem:[#allocation5 + $0x60] sm:$0xff] }
 0x18d   : > { %1852 = vmatpush3.msra.mxu1 %v845_v10  ;;  %2104 = vmatpush3.msra.mxu0 %v877_v11  ;;  %v1079_v10 = vld [vmem:[#allocation5 + $0x160] sm:$0xff]  ;;  %v1062_v11 = vld [vmem:[#allocation5 + $0xd8] sm:$0xff] }
 0x18e   : > { %1853 = vmatprep.subr.mxu1 %v860_v12  ;;  %2105 = vmatprep.subr.mxu0 %v2469_v0  ;;  %v1046_v12 = vld [vmem:[#allocation5 + $0x58] sm:$0xff] }
 0x18f   : > { %1854 = vmatpush3.msra.mxu1 %v844_v13  ;;  %2106 = vmatpush3.msra.mxu0 %v876_v14  ;;  %v1078_v13 = vld [vmem:[#allocation5 + $0x158] sm:$0xff]  ;;  %v1061_v14 = vld [vmem:[#allocation5 + $0xd0] sm:$0xff] }
 0x190   : > { %1855 = vmatprep.subr.mxu1 %v859_v15  ;;  %2107 = vmatprep.subr.mxu0 %v2469_v0  ;;  %v1045_v15 = vld [vmem:[#allocation5 + $0x50] sm:$0xff] }
 0x191   : > { %1856 = vmatpush3.msra.mxu1 %v843_v16  ;;  %2108 = vmatpush3.msra.mxu0 %v875_v17  ;;  %v1077_v16 = vld [vmem:[#allocation5 + $0x150] sm:$0xff]  ;;  %v1060_v17 = vld [vmem:[#allocation5 + $0xc8] sm:$0xff] }
 0x192   : > { %1857 = vmatprep.subr.mxu1 %v858_v18  ;;  %2109 = vmatprep.subr.mxu0 %v2469_v0  ;;  %v1044_v18 = vld [vmem:[#allocation5 + $0x48] sm:$0xff] }
 0x193   : > { %1858 = vmatpush3.msra.mxu1 %v842_v19  ;;  %2110 = vmatpush3.msra.mxu0 %v874_v20  ;;  %v1076_v19 = vld [vmem:[#allocation5 + $0x148] sm:$0xff]  ;;  %v1059_v20 = vld [vmem:[#allocation5 + $0xc0] sm:$0xff] }
 0x194   : > { %1859 = vmatprep.subr.mxu1 %v857_v21  ;;  %2111 = vmatprep.subr.mxu0 %v2469_v0  ;;  %v1043_v21 = vld [vmem:[#allocation5 + $0x40] sm:$0xff] }
 0x195   : > { %1860 = vmatpush3.msra.mxu1 %v841_v22  ;;  %2112 = vmatpush3.msra.mxu0 %v873_v23  ;;  %v1075_v22 = vld [vmem:[#allocation5 + $0x140] sm:$0xff]  ;;  %v1058_v23 = vld [vmem:[#allocation5 + $0xb8] sm:$0xff] }
 0x196   : > { %1861 = vmatprep.subr.mxu1 %v856_v24  ;;  %2113 = vmatprep.subr.mxu0 %v2469_v0  ;;  %v1042_v24 = vld [vmem:[#allocation5 + $0x38] sm:$0xff] }
 0x197   : > { %1862 = vmatpush3.msra.mxu1 %v840_v25  ;;  %2114 = vmatpush3.msra.mxu0 %v872_v26  ;;  %v1074_v25 = vld [vmem:[#allocation5 + $0x138] sm:$0xff]  ;;  %v1057_v26 = vld [vmem:[#allocation5 + $0xb0] sm:$0xff] }
 0x198   : > { %1863 = vmatprep.subr.mxu1 %v855_v27  ;;  %2115 = vmatprep.subr.mxu0 %v2469_v0  ;;  %v1041_v27 = vld [vmem:[#allocation5 + $0x30] sm:$0xff] }
 0x199   : > { %1864 = vmatpush3.msra.mxu1 %v839_v28  ;;  %2116 = vmatpush3.msra.mxu0 %v871_v29  ;;  %v1073_v28 = vld [vmem:[#allocation5 + $0x130] sm:$0xff]  ;;  %v1056_v29 = vld [vmem:[#allocation5 + $0xa8] sm:$0xff] }
 0x19a   : > { %1865 = vmatprep.subr.mxu1 %v854_v30  ;;  %2117 = vmatprep.subr.mxu0 %v2469_v0  ;;  %v1040_v30 = vld [vmem:[#allocation5 + $0x28] sm:$0xff] }
 0x19b   : > { %2131 = vmatprep.mubr.msk.f32.mxu0 %vm2470_vm0, %v2469_v0  ;;  %1866 = vmatpush3.msra.mxu1 %v838_v31  ;;  %v1072_v31 = vld [vmem:[#allocation5 + $0x128] sm:$0xff] }
 0x19c   : > { %2118 = vmatpush3.msra.mxu0 %v870_v32  ;;  %1867 = vmatprep.subr.mxu1 %v853_v33  ;;  %v1055_v32 = vld [vmem:[#allocation5 + $0xa0] sm:$0xff] }
 0x19d   : > { %2119 = vmatprep.subr.mxu0 %v2469_v0  ;;  %1868 = vmatpush3.msra.mxu1 %v837_v34  ;;  %v1039_v33 = vld [vmem:[#allocation5 + $0x20] sm:$0xff] }
 0x19e   : > { %2120 = vmatpush3.msra.mxu0 %v869_v35  ;;  %1869 = vmatprep.subr.mxu1 %v852_v36  ;;  %v1071_v34 = vld [vmem:[#allocation5 + $0x120] sm:$0xff]  ;;  %v1054_v35 = vld [vmem:[#allocation5 + $0x98] sm:$0xff] }
 0x19f   : > { %2121 = vmatprep.subr.mxu0 %v2469_v0  ;;  %1870 = vmatpush3.msra.mxu1 %v836_v37  ;;  %v1038_v36 = vld [vmem:[#allocation5 + $0x18] sm:$0xff] }
 0x1a0   : > { %2122 = vmatpush3.msra.mxu0 %v868_v38  ;;  %1871 = vmatprep.subr.mxu1 %v851_v39  ;;  %v1070_v37 = vld [vmem:[#allocation5 + $0x118] sm:$0xff]  ;;  %v1053_v38 = vld [vmem:[#allocation5 + $0x90] sm:$0xff] }
 0x1a1   : > { %2123 = vmatprep.subr.mxu0 %v2469_v0  ;;  %1872 = vmatpush3.msra.mxu1 %v835_v40  ;;  %v1037_v39 = vld [vmem:[#allocation5 + $0x10] sm:$0xff] }
 0x1a2   : > { %2124 = vmatpush3.msra.mxu0 %v867_v41  ;;  %1873 = vmatprep.subr.mxu1 %v850_v42  ;;  %v1069_v40 = vld [vmem:[#allocation5 + $0x110] sm:$0xff]  ;;  %v1052_v41 = vld [vmem:[#allocation5 + $0x88] sm:$0xff] }
 0x1a3   : > { %2125 = vmatprep.subr.mxu0 %v2469_v0  ;;  %1874 = vmatpush3.msra.mxu1 %v834_v43  ;;  %v1036_v42 = vld [vmem:[#allocation5 + $0x8] sm:$0xff] }
 0x1a4   : > { %2126 = vmatpush3.msra.mxu0 %v866_v44  ;;  %1875 = vmatprep.subr.mxu1 %v849_v45  ;;  %v1068_v43 = vld [vmem:[#allocation5 + $0x108] sm:$0xff]  ;;  %v1051_v44 = vld [vmem:[#allocation5 + $0x80] sm:$0xff] }
 0x1a5   : > { %2127 = vmatprep.subr.mxu0 %v2469_v0  ;;  %1876 = vmatpush3.msra.mxu1 %v833_v46  ;;  %v1035_v45 = vld [vmem:[#allocation5] sm:$0xff] }
 0x1a6   : > { %2128 = vmatpush3.msra.mxu0 %v865_v47  ;;  %1877 = vmatprep.subr.mxu1 %v848_v48  ;;  %v1067_v46 = vld [vmem:[#allocation5 + $0x100] sm:$0xff]  ;;  %v1269_v47 = vld [vmem:[#allocation7 + $0xf8] sm:$0xff] }
 0x1a7   : > { %2129 = vmatprep.subr.mxu0 %v2469_v0  ;;  %1878 = vmatpush3.msra.mxu1 %v832_v49 }
 0x1a8   : > { %2130 = vmatpush3.msra.mxu0 %v864_v50  ;;  %1899 = vmatprep.subr.mxu1 %v1066_v51  ;;  %v1782_v50 = vld [vmem:[%s3109_s6] ss:$0 sm:$0xff] }
 0x1a9   : > { %2134 = vmatprep.subr.mxu0 %v2469_v0 }
 0x248   : > { %v1827_v52 = vpop.f32.mrf.mxu1  ;;  %v827_v53 = vpop.f32.mrf.mxu0 }
 0x24a   : > { %v1828_v55 = vpop.f32.mrf.mxu1  ;;  %v2098_v56 = vpop.f32.mrf.mxu0 }
 0x24b   : > { %v1829_v57 = vadd.f32 %v1828_v55, %v1827_v52 }
 0x24d   : > { %v758_v58 = vadd.f32 %v1829_v57, %v1781_v54 }
 0x24f   : > { %v828_v59 = vadd.f32 %v827_v53, %v758_v58 }
 0x251   : > { %v831_v60 = vmax.f32 %v828_v59, 0.0  ;;  %v1253_v59 = vld [vmem:[#allocation7 + $0x78] sm:$0xff] }
 0x253   : > { %958 = vmatprep.mubr.f32.mxu1 %v831_v60  ;;  %v882_v61 = vrot.slane %v831_v60, 7  ;;  %v885_v62 = vrot.slane %v831_v60, 1  ;;  %v1285_v60 = vld [vmem:[#allocation7 + $0x178] sm:$0xff] }
 0x255   : > { %959 = vmatmul.mubr.f32.vlgmr.msra.gmra.mxu1 %v882_v61  ;;  %2132 = vmatmul.mubr.f32.vlgmr.msra.gmra.mxu0 %v885_v62  ;;  %v1268_v61 = vld [vmem:[#allocation7 + $0xf0] sm:$0xff] }
 0x256   : > { %1900 = vmatpush3.msra.mxu1 %v1050_v63  ;;  %2135 = vmatpush3.msra.mxu0 %v1082_v1  ;;  %v1252_v62 = vld [vmem:[#allocation7 + $0x70] sm:$0xff]  ;;  %v1267_v1 = vld [vmem:[#allocation7 + $0xe8] sm:$0xff] }
 0x257   : > { %1901 = vmatprep.subr.mxu1 %v1065_v2  ;;  %2136 = vmatprep.subr.mxu0 %v2469_v0  ;;  %v1284_v63 = vld [vmem:[#allocation7 + $0x170] sm:$0xff]  ;;  %v1251_v2 = vld [vmem:[#allocation7 + $0x68] sm:$0xff] }
 0x258   : > { %1902 = vmatpush3.msra.mxu1 %v1049_v3  ;;  %2137 = vmatpush3.msra.mxu0 %v1081_v4  ;;  %v1283_v3 = vld [vmem:[#allocation7 + $0x168] sm:$0xff]  ;;  %v1266_v4 = vld [vmem:[#allocation7 + $0xe0] sm:$0xff] }
 0x259   : > { %1903 = vmatprep.subr.mxu1 %v1064_v5  ;;  %2138 = vmatprep.subr.mxu0 %v2469_v0  ;;  %v1250_v5 = vld [vmem:[#allocation7 + $0x60] sm:$0xff] }
 0x25a   : > { %1904 = vmatpush3.msra.mxu1 %v1048_v6  ;;  %2139 = vmatpush3.msra.mxu0 %v1080_v7  ;;  %v1282_v6 = vld [vmem:[#allocation7 + $0x160] sm:$0xff]  ;;  %v1265_v7 = vld [vmem:[#allocation7 + $0xd8] sm:$0xff] }
 0x25b   : > { %1905 = vmatprep.subr.mxu1 %v1063_v8  ;;  %2140 = vmatprep.subr.mxu0 %v2469_v0  ;;  %v1249_v8 = vld [vmem:[#allocation7 + $0x58] sm:$0xff] }
 0x25c   : > { %1906 = vmatpush3.msra.mxu1 %v1047_v9  ;;  %2141 = vmatpush3.msra.mxu0 %v1079_v10  ;;  %v1281_v9 = vld [vmem:[#allocation7 + $0x158] sm:$0xff]  ;;  %v1264_v10 = vld [vmem:[#allocation7 + $0xd0] sm:$0xff] }
 0x25d   : > { %1907 = vmatprep.subr.mxu1 %v1062_v11  ;;  %2142 = vmatprep.subr.mxu0 %v2469_v0  ;;  %v1248_v11 = vld [vmem:[#allocation7 + $0x50] sm:$0xff] }
 0x25e   : > { %1908 = vmatpush3.msra.mxu1 %v1046_v12  ;;  %2143 = vmatpush3.msra.mxu0 %v1078_v13  ;;  %v1280_v12 = vld [vmem:[#allocation7 + $0x150] sm:$0xff]  ;;  %v1263_v13 = vld [vmem:[#allocation7 + $0xc8] sm:$0xff] }
 0x25f   : > { %1909 = vmatprep.subr.mxu1 %v1061_v14  ;;  %2144 = vmatprep.subr.mxu0 %v2469_v0  ;;  %v1247_v14 = vld [vmem:[#allocation7 + $0x48] sm:$0xff] }
 0x260   : > { %1910 = vmatpush3.msra.mxu1 %v1045_v15  ;;  %2145 = vmatpush3.msra.mxu0 %v1077_v16  ;;  %v1279_v15 = vld [vmem:[#allocation7 + $0x148] sm:$0xff]  ;;  %v1262_v16 = vld [vmem:[#allocation7 + $0xc0] sm:$0xff] }
 0x261   : > { %1911 = vmatprep.subr.mxu1 %v1060_v17  ;;  %2146 = vmatprep.subr.mxu0 %v2469_v0  ;;  %v1246_v17 = vld [vmem:[#allocation7 + $0x40] sm:$0xff] }
 0x262   : > { %1912 = vmatpush3.msra.mxu1 %v1044_v18  ;;  %2147 = vmatpush3.msra.mxu0 %v1076_v19  ;;  %v1278_v18 = vld [vmem:[#allocation7 + $0x140] sm:$0xff]  ;;  %v1261_v19 = vld [vmem:[#allocation7 + $0xb8] sm:$0xff] }
 0x263   : > { %1913 = vmatprep.subr.mxu1 %v1059_v20  ;;  %2148 = vmatprep.subr.mxu0 %v2469_v0  ;;  %v1245_v20 = vld [vmem:[#allocation7 + $0x38] sm:$0xff] }
 0x264   : > { %1914 = vmatpush3.msra.mxu1 %v1043_v21  ;;  %2149 = vmatpush3.msra.mxu0 %v1075_v22  ;;  %v1277_v21 = vld [vmem:[#allocation7 + $0x138] sm:$0xff]  ;;  %v1260_v22 = vld [vmem:[#allocation7 + $0xb0] sm:$0xff] }
 0x265   : > { %1915 = vmatprep.subr.mxu1 %v1058_v23  ;;  %2150 = vmatprep.subr.mxu0 %v2469_v0  ;;  %v1244_v23 = vld [vmem:[#allocation7 + $0x30] sm:$0xff] }
 0x266   : > { %1916 = vmatpush3.msra.mxu1 %v1042_v24  ;;  %2151 = vmatpush3.msra.mxu0 %v1074_v25  ;;  %v1276_v24 = vld [vmem:[#allocation7 + $0x130] sm:$0xff]  ;;  %v1259_v25 = vld [vmem:[#allocation7 + $0xa8] sm:$0xff] }
 0x267   : > { %1917 = vmatprep.subr.mxu1 %v1057_v26  ;;  %2152 = vmatprep.subr.mxu0 %v2469_v0  ;;  %v1243_v26 = vld [vmem:[#allocation7 + $0x28] sm:$0xff] }
 0x268   : > { %2166 = vmatprep.mubr.msk.f32.mxu0 %vm2470_vm0, %v2469_v0  ;;  %1918 = vmatpush3.msra.mxu1 %v1041_v27  ;;  %v1275_v27 = vld [vmem:[#allocation7 + $0x128] sm:$0xff] }
 0x269   : > { %2153 = vmatpush3.msra.mxu0 %v1073_v28  ;;  %1919 = vmatprep.subr.mxu1 %v1056_v29  ;;  %v1258_v28 = vld [vmem:[#allocation7 + $0xa0] sm:$0xff] }
 0x26a   : > { %2154 = vmatprep.subr.mxu0 %v2469_v0  ;;  %1920 = vmatpush3.msra.mxu1 %v1040_v30  ;;  %v1242_v29 = vld [vmem:[#allocation7 + $0x20] sm:$0xff] }
 0x26b   : > { %2155 = vmatpush3.msra.mxu0 %v1072_v31  ;;  %1921 = vmatprep.subr.mxu1 %v1055_v32  ;;  %v1274_v30 = vld [vmem:[#allocation7 + $0x120] sm:$0xff]  ;;  %v1257_v31 = vld [vmem:[#allocation7 + $0x98] sm:$0xff] }
 0x26c   : > { %2156 = vmatprep.subr.mxu0 %v2469_v0  ;;  %1922 = vmatpush3.msra.mxu1 %v1039_v33  ;;  %v1241_v32 = vld [vmem:[#allocation7 + $0x18] sm:$0xff] }
 0x26d   : > { %2157 = vmatpush3.msra.mxu0 %v1071_v34  ;;  %1923 = vmatprep.subr.mxu1 %v1054_v35  ;;  %v1273_v33 = vld [vmem:[#allocation7 + $0x118] sm:$0xff]  ;;  %v1256_v34 = vld [vmem:[#allocation7 + $0x90] sm:$0xff] }
 0x26e   : > { %2158 = vmatprep.subr.mxu0 %v2469_v0  ;;  %1924 = vmatpush3.msra.mxu1 %v1038_v36  ;;  %v1240_v35 = vld [vmem:[#allocation7 + $0x10] sm:$0xff] }
 0x26f   : > { %2159 = vmatpush3.msra.mxu0 %v1070_v37  ;;  %1925 = vmatprep.subr.mxu1 %v1053_v38  ;;  %v1272_v36 = vld [vmem:[#allocation7 + $0x110] sm:$0xff]  ;;  %v1255_v37 = vld [vmem:[#allocation7 + $0x88] sm:$0xff] }
 0x270   : > { %2160 = vmatprep.subr.mxu0 %v2469_v0  ;;  %1926 = vmatpush3.msra.mxu1 %v1037_v39  ;;  %v1239_v38 = vld [vmem:[#allocation7 + $0x8] sm:$0xff] }
 0x271   : > { %2161 = vmatpush3.msra.mxu0 %v1069_v40  ;;  %1927 = vmatprep.subr.mxu1 %v1052_v41  ;;  %v1271_v39 = vld [vmem:[#allocation7 + $0x108] sm:$0xff]  ;;  %v1254_v40 = vld [vmem:[#allocation7 + $0x80] sm:$0xff] }
 0x272   : > { %2162 = vmatprep.subr.mxu0 %v2469_v0  ;;  %1928 = vmatpush3.msra.mxu1 %v1036_v42  ;;  %v1238_v41 = vld [vmem:[#allocation7] sm:$0xff] }
 0x273   : > { %2163 = vmatpush3.msra.mxu0 %v1068_v43  ;;  %1929 = vmatprep.subr.mxu1 %v1051_v44  ;;  %v1270_v42 = vld [vmem:[#allocation7 + $0x100] sm:$0xff]  ;;  %v1472_v43 = vld [vmem:[%s3114_s11 + $0xf8] sm:$0xff] }
 0x274   : > { %2164 = vmatprep.subr.mxu0 %v2469_v0  ;;  %1930 = vmatpush3.msra.mxu1 %v1035_v45 }
 0x275   : > { %2165 = vmatpush3.msra.mxu0 %v1067_v46  ;;  %1951 = vmatprep.subr.mxu1 %v1269_v47  ;;  %v1783_v46 = vld [vmem:[%s3111_s8] ss:$0 sm:$0xff] }
 0x276   : > { %2169 = vmatprep.subr.mxu0 %v2469_v0 }
 0x315   : > { %v1879_v48 = vpop.f32.mrf.mxu1  ;;  %v1030_v49 = vpop.f32.mrf.mxu0 }
 0x317   : > { %v1880_v51 = vpop.f32.mrf.mxu1  ;;  %v2133_v52 = vpop.f32.mrf.mxu0 }
 0x318   : > { %v1881_v53 = vadd.f32 %v1880_v51, %v1879_v48 }
 0x31a   : > { %v961_v54 = vadd.f32 %v1881_v53, %v1782_v50 }
 0x31c   : > { %v1031_v55 = vadd.f32 %v1030_v49, %v961_v54 }
 0x31e   : > { %v1034_v56 = vmax.f32 %v1031_v55, 0.0  ;;  %v1456_v55 = vld [vmem:[%s3114_s11 + $0x78] sm:$0xff] }
 0x320   : > { %1161 = vmatprep.mubr.f32.mxu1 %v1034_v56  ;;  %v1085_v57 = vrot.slane %v1034_v56, 7  ;;  %v1088_v58 = vrot.slane %v1034_v56, 1  ;;  %v1488_v56 = vld [vmem:[%s3114_s11 + $0x178] sm:$0xff] }
 0x322   : > { %1162 = vmatmul.mubr.f32.vlgmr.msra.gmra.mxu1 %v1085_v57  ;;  %2167 = vmatmul.mubr.f32.vlgmr.msra.gmra.mxu0 %v1088_v58  ;;  %v1471_v57 = vld [vmem:[%s3114_s11 + $0xf0] sm:$0xff] }
 0x323   : > { %1952 = vmatpush3.msra.mxu1 %v1253_v59  ;;  %2170 = vmatpush3.msra.mxu0 %v1285_v60  ;;  %v1455_v58 = vld [vmem:[%s3114_s11 + $0x70] sm:$0xff]  ;;  %v1470_v60 = vld [vmem:[%s3114_s11 + $0xe8] sm:$0xff] }
 0x324   : > { %1953 = vmatprep.subr.mxu1 %v1268_v61  ;;  %2171 = vmatprep.subr.mxu0 %v2469_v0  ;;  %v1487_v59 = vld [vmem:[%s3114_s11 + $0x170] sm:$0xff]  ;;  %v1454_v61 = vld [vmem:[%s3114_s11 + $0x68] sm:$0xff] }
 0x325   : > { %1954 = vmatpush3.msra.mxu1 %v1252_v62  ;;  %2172 = vmatpush3.msra.mxu0 %v1284_v63  ;;  %v1486_v62 = vld [vmem:[%s3114_s11 + $0x168] sm:$0xff]  ;;  %v1469_v63 = vld [vmem:[%s3114_s11 + $0xe0] sm:$0xff] }
 0x326   : > { %1955 = vmatprep.subr.mxu1 %v1267_v1  ;;  %2173 = vmatprep.subr.mxu0 %v2469_v0  ;;  %v1453_v1 = vld [vmem:[%s3114_s11 + $0x60] sm:$0xff] }
 0x327   : > { %1956 = vmatpush3.msra.mxu1 %v1251_v2  ;;  %2174 = vmatpush3.msra.mxu0 %v1283_v3  ;;  %v1485_v2 = vld [vmem:[%s3114_s11 + $0x160] sm:$0xff]  ;;  %v1468_v3 = vld [vmem:[%s3114_s11 + $0xd8] sm:$0xff] }
 0x328   : > { %1957 = vmatprep.subr.mxu1 %v1266_v4  ;;  %2175 = vmatprep.subr.mxu0 %v2469_v0  ;;  %v1452_v4 = vld [vmem:[%s3114_s11 + $0x58] sm:$0xff] }
 0x329   : > { %1958 = vmatpush3.msra.mxu1 %v1250_v5  ;;  %2176 = vmatpush3.msra.mxu0 %v1282_v6  ;;  %v1484_v5 = vld [vmem:[%s3114_s11 + $0x158] sm:$0xff]  ;;  %v1467_v6 = vld [vmem:[%s3114_s11 + $0xd0] sm:$0xff] }
 0x32a   : > { %1959 = vmatprep.subr.mxu1 %v1265_v7  ;;  %2177 = vmatprep.subr.mxu0 %v2469_v0  ;;  %v1451_v7 = vld [vmem:[%s3114_s11 + $0x50] sm:$0xff] }
 0x32b   : > { %1960 = vmatpush3.msra.mxu1 %v1249_v8  ;;  %2178 = vmatpush3.msra.mxu0 %v1281_v9  ;;  %v1483_v8 = vld [vmem:[%s3114_s11 + $0x150] sm:$0xff]  ;;  %v1466_v9 = vld [vmem:[%s3114_s11 + $0xc8] sm:$0xff] }
 0x32c   : > { %1961 = vmatprep.subr.mxu1 %v1264_v10  ;;  %2179 = vmatprep.subr.mxu0 %v2469_v0  ;;  %v1450_v10 = vld [vmem:[%s3114_s11 + $0x48] sm:$0xff] }
 0x32d   : > { %1962 = vmatpush3.msra.mxu1 %v1248_v11  ;;  %2180 = vmatpush3.msra.mxu0 %v1280_v12  ;;  %v1482_v11 = vld [vmem:[%s3114_s11 + $0x148] sm:$0xff]  ;;  %v1465_v12 = vld [vmem:[%s3114_s11 + $0xc0] sm:$0xff] }
 0x32e   : > { %1963 = vmatprep.subr.mxu1 %v1263_v13  ;;  %2181 = vmatprep.subr.mxu0 %v2469_v0  ;;  %v1449_v13 = vld [vmem:[%s3114_s11 + $0x40] sm:$0xff] }
 0x32f   : > { %1964 = vmatpush3.msra.mxu1 %v1247_v14  ;;  %2182 = vmatpush3.msra.mxu0 %v1279_v15  ;;  %v1481_v14 = vld [vmem:[%s3114_s11 + $0x140] sm:$0xff]  ;;  %v1464_v15 = vld [vmem:[%s3114_s11 + $0xb8] sm:$0xff] }
 0x330   : > { %1965 = vmatprep.subr.mxu1 %v1262_v16  ;;  %2183 = vmatprep.subr.mxu0 %v2469_v0  ;;  %v1448_v16 = vld [vmem:[%s3114_s11 + $0x38] sm:$0xff] }
 0x331   : > { %1966 = vmatpush3.msra.mxu1 %v1246_v17  ;;  %2184 = vmatpush3.msra.mxu0 %v1278_v18  ;;  %v1480_v17 = vld [vmem:[%s3114_s11 + $0x138] sm:$0xff]  ;;  %v1463_v18 = vld [vmem:[%s3114_s11 + $0xb0] sm:$0xff] }
 0x332   : > { %1967 = vmatprep.subr.mxu1 %v1261_v19  ;;  %2185 = vmatprep.subr.mxu0 %v2469_v0  ;;  %v1447_v19 = vld [vmem:[%s3114_s11 + $0x30] sm:$0xff] }
 0x333   : > { %1968 = vmatpush3.msra.mxu1 %v1245_v20  ;;  %2186 = vmatpush3.msra.mxu0 %v1277_v21  ;;  %v1479_v20 = vld [vmem:[%s3114_s11 + $0x130] sm:$0xff]  ;;  %v1462_v21 = vld [vmem:[%s3114_s11 + $0xa8] sm:$0xff] }
 0x334   : > { %1969 = vmatprep.subr.mxu1 %v1260_v22  ;;  %2187 = vmatprep.subr.mxu0 %v2469_v0  ;;  %v1446_v22 = vld [vmem:[%s3114_s11 + $0x28] sm:$0xff] }
 0x335   : > { %2201 = vmatprep.mubr.msk.f32.mxu0 %vm2470_vm0, %v2469_v0  ;;  %1970 = vmatpush3.msra.mxu1 %v1244_v23  ;;  %v1478_v23 = vld [vmem:[%s3114_s11 + $0x128] sm:$0xff] }
 0x336   : > { %2188 = vmatpush3.msra.mxu0 %v1276_v24  ;;  %1971 = vmatprep.subr.mxu1 %v1259_v25  ;;  %v1461_v24 = vld [vmem:[%s3114_s11 + $0xa0] sm:$0xff] }
 0x337   : > { %2189 = vmatprep.subr.mxu0 %v2469_v0  ;;  %1972 = vmatpush3.msra.mxu1 %v1243_v26  ;;  %v1445_v25 = vld [vmem:[%s3114_s11 + $0x20] sm:$0xff] }
 0x338   : > { %2190 = vmatpush3.msra.mxu0 %v1275_v27  ;;  %1973 = vmatprep.subr.mxu1 %v1258_v28  ;;  %v1477_v26 = vld [vmem:[%s3114_s11 + $0x120] sm:$0xff]  ;;  %v1460_v27 = vld [vmem:[%s3114_s11 + $0x98] sm:$0xff] }
 0x339   : > { %2191 = vmatprep.subr.mxu0 %v2469_v0  ;;  %1974 = vmatpush3.msra.mxu1 %v1242_v29  ;;  %v1444_v28 = vld [vmem:[%s3114_s11 + $0x18] sm:$0xff] }
 0x33a   : > { %2192 = vmatpush3.msra.mxu0 %v1274_v30  ;;  %1975 = vmatprep.subr.mxu1 %v1257_v31  ;;  %v1476_v29 = vld [vmem:[%s3114_s11 + $0x118] sm:$0xff]  ;;  %v1459_v30 = vld [vmem:[%s3114_s11 + $0x90] sm:$0xff] }
 0x33b   : > { %2193 = vmatprep.subr.mxu0 %v2469_v0  ;;  %1976 = vmatpush3.msra.mxu1 %v1241_v32  ;;  %v1443_v31 = vld [vmem:[%s3114_s11 + $0x10] sm:$0xff] }
 0x33c   : > { %2194 = vmatpush3.msra.mxu0 %v1273_v33  ;;  %1977 = vmatprep.subr.mxu1 %v1256_v34  ;;  %v1475_v32 = vld [vmem:[%s3114_s11 + $0x110] sm:$0xff]  ;;  %v1458_v33 = vld [vmem:[%s3114_s11 + $0x88] sm:$0xff] }
 0x33d   : > { %2195 = vmatprep.subr.mxu0 %v2469_v0  ;;  %1978 = vmatpush3.msra.mxu1 %v1240_v35  ;;  %v1442_v34 = vld [vmem:[%s3114_s11 + $0x8] sm:$0xff] }
 0x33e   : > { %2196 = vmatpush3.msra.mxu0 %v1272_v36  ;;  %1979 = vmatprep.subr.mxu1 %v1255_v37  ;;  %v1474_v35 = vld [vmem:[%s3114_s11 + $0x108] sm:$0xff]  ;;  %v1457_v36 = vld [vmem:[%s3114_s11 + $0x80] sm:$0xff] }
 0x33f   : > { %2197 = vmatprep.subr.mxu0 %v2469_v0  ;;  %1980 = vmatpush3.msra.mxu1 %v1239_v38  ;;  %v1441_v37 = vld [vmem:[%s3114_s11] sm:$0xff] }
 0x340   : > { %2198 = vmatpush3.msra.mxu0 %v1271_v39  ;;  %1981 = vmatprep.subr.mxu1 %v1254_v40  ;;  %v1473_v38 = vld [vmem:[%s3114_s11 + $0x100] sm:$0xff]  ;;  %v481_v39 = vlaneseq }
 0x341   : > { %2199 = vmatprep.subr.mxu0 %v2469_v0  ;;  %1982 = vmatpush3.msra.mxu1 %v1238_v41 }
 0x342   : > { %2200 = vmatpush3.msra.mxu0 %v1270_v42  ;;  %2003 = vmatprep.subr.mxu1 %v1472_v43  ;;  %v482_v40 = vshrl.u32 %v481_v39, 7  ;;  %v484_v41 = vand.u32 127, %v481_v39 }
 0x343   : > { %2204 = vmatprep.subr.mxu0 %v2469_v0 }
 0x344   : > { %v485_v42 = vadd.s32 %v484_v41, %v482_v40 }
 0x346   : > { %v490_v43 = vand.u32 1, %v485_v42 }
 0x348   : > { %vm498_vm4 = vcmp.eq.s32.totalorder %v490_v43, 0 }
 0x3e2   : > { %v1931_v44 = vpop.f32.mrf.mxu1  ;;  %v1233_v45 = vpop.f32.mrf.mxu0 }
 0x3e4   : > { %v1932_v47 = vpop.f32.mrf.mxu1  ;;  %v2168_v48 = vpop.f32.mrf.mxu0 }
 0x3e5   : > { %v1933_v49 = vadd.f32 %v1932_v47, %v1931_v44  ;;  %v1778_v44 = vsel %vm498_vm4, 1.0, %v2469_v0 }
 0x3e7   : > { %v1164_v50 = vadd.f32 %v1933_v49, %v1783_v46 }
 0x3e9   : > { %v1234_v51 = vadd.f32 %v1233_v45, %v1164_v50  ;;  %v2315_v45 = vld [vmem:[%s2649_s16] sm:$0xff]  ;;  %s473_s16 = sand.u32 1, %s2454_s26  }
 0x3ea   : > { %v501_v46 = vmul.f32 %v2315_v45, %v1778_v44  ;;  %v1784_v50 = vld [vmem:[%s3113_s10] ss:$0 sm:$0xff]  ;;  %s1776_s24 = sshll.u32 %s473_s16, 3  ;;  %s1663_s30 = scalar_lea.sflag [#allocation4], %s473_s16 }
 0x3eb   : > { %v1237_v52 = vmax.f32 %v1234_v51, 0.0  ;;  %s475_s14 = scalar_lea.vmem [#allocation8], %s1776_s24  ;;  %s2400_s24 = scalar_lea.vmem %s2399_s29, 256 }
 0x3ec   : > { %v503_v47 = vsel %vm502_vm1, %v501_v46, 0.0  ;;  %s1676_s22 = sshll.u32 %s475_s14, 4  ;;  %s1677_s22 = int_to_ptr.vmem [resolvable:$true] %s1676_s22 }
 0x3ed   : > { %1364 = vmatprep.mubr.f32.mxu1 %v1237_v52  ;;  %v1288_v53 = vrot.slane %v1237_v52, 7  ;;  %v1291_v54 = vrot.slane %v1237_v52, 1  ;;  %504 = vadd.xlane.f32.xlu1 %v503_v47  ;;  %s2394_s21 = scalar_lea.vmem %s1677_s22, 128  ;;  %p2401_p7 = scmp.lt.s32.totalorder %s1677_s22, %s2399_s29 }
 0x3ee   : > { %p2395_p10 = scmp.ne.s32.totalorder %s1677_s22, %s2394_s21  ;;  %p2402_p8 = scmp.lt.s32.totalorder %s2400_s24, %s2394_s21 }
 0x3ef   : > { %1365 = vmatmul.mubr.f32.vlgmr.msra.gmra.mxu1 %v1288_v53  ;;  %2202 = vmatmul.mubr.f32.vlgmr.msra.gmra.mxu0 %v1291_v54 }
 0x3f0   : > { %2004 = vmatpush3.msra.mxu1 %v1456_v55  ;;  %2205 = vmatpush3.msra.mxu0 %v1488_v56  ;;  %p2396_p2 = pnand %p2395_p10, %p3135_p12  ;;  %p2403_p11 = por %p2402_p8, %p2401_p7 }
 0x3f1   : > { %2005 = vmatprep.subr.mxu1 %v1471_v57  ;;  %2206 = vmatprep.subr.mxu0 %v2469_v0 }
 0x3f2   : > { %2006 = vmatpush3.msra.mxu1 %v1455_v58  ;;  %2207 = vmatpush3.msra.mxu0 %v1487_v59  ;;  %p2397_p4 = pneg %p2396_p2 }
 0x3f3   : > { %2007 = vmatprep.subr.mxu1 %v1470_v60  ;;  %2208 = vmatprep.subr.mxu0 %v2469_v0 }
 0x3f4   : > { %2008 = vmatpush3.msra.mxu1 %v1454_v61  ;;  %2209 = vmatpush3.msra.mxu0 %v1486_v62  ;;  %p2404_p0 = pnand %p2403_p11, %p2397_p4 }
 0x3f5   : > { %2009 = vmatprep.subr.mxu1 %v1469_v63  ;;  %2210 = vmatprep.subr.mxu0 %v2469_v0 }
 0x3f6   : > { %2010 = vmatpush3.msra.mxu1 %v1453_v1  ;;  %2211 = vmatpush3.msra.mxu0 %v1485_v2 }
 0x3f7   : > { %2011 = vmatprep.subr.mxu1 %v1468_v3  ;;  %2212 = vmatprep.subr.mxu0 %v2469_v0 }
 0x3f8   : > { %2012 = vmatpush3.msra.mxu1 %v1452_v4  ;;  %2213 = vmatpush3.msra.mxu0 %v1484_v5 }
 0x3f9   : > { %2013 = vmatprep.subr.mxu1 %v1467_v6  ;;  %2214 = vmatprep.subr.mxu0 %v2469_v0 }
 0x3fa   : > { %2014 = vmatpush3.msra.mxu1 %v1451_v7  ;;  %2215 = vmatpush3.msra.mxu0 %v1483_v8 }
 0x3fb   : > { %2015 = vmatprep.subr.mxu1 %v1466_v9  ;;  %2216 = vmatprep.subr.mxu0 %v2469_v0 }
 0x3fc   : > { %2016 = vmatpush3.msra.mxu1 %v1450_v10  ;;  %2217 = vmatpush3.msra.mxu0 %v1482_v11 }
 0x3fd   : > { %2017 = vmatprep.subr.mxu1 %v1465_v12  ;;  %2218 = vmatprep.subr.mxu0 %v2469_v0  ;;  %v1647_v12 = vand.u32 7, %v484_v41 }
 0x3fe   : > { %2018 = vmatpush3.msra.mxu1 %v1449_v13  ;;  %2219 = vmatpush3.msra.mxu0 %v1481_v14 }
 0x3ff   : > { %2019 = vmatprep.subr.mxu1 %v1464_v15  ;;  %2220 = vmatprep.subr.mxu0 %v2469_v0  ;;  %vm1655_vm6 = vcmp.ge.s32.totalorder %v1647_v12, 4 }
 0x400   : > { %2020 = vmatpush3.msra.mxu1 %v1448_v16  ;;  %2221 = vmatpush3.msra.mxu0 %v1480_v17  ;;  %v1785_v16 = vld [vmem:[%s3115_s12] ss:$0 sm:$0xff] }
 0x401   : > { %2021 = vmatprep.subr.mxu1 %v1463_v18  ;;  %2222 = vmatprep.subr.mxu0 %v2469_v0 }
 0x402   : > { %2236 = vmatprep.mubr.msk.f32.mxu0 %vm2470_vm0, %v2469_v0  ;;  %2022 = vmatpush3.msra.mxu1 %v1447_v19 }
 0x403   : > { %2223 = vmatpush3.msra.mxu0 %v1479_v20  ;;  %2023 = vmatprep.subr.mxu1 %v1462_v21  ;;  %v1786_v21 = vsel %vm1655_vm6, 1.0, %v2469_v0 }
 0x404   : > { %2224 = vmatprep.subr.mxu0 %v2469_v0  ;;  %2024 = vmatpush3.msra.mxu1 %v1446_v22 }
 0x405   : > { %2225 = vmatpush3.msra.mxu0 %v1478_v23  ;;  %2025 = vmatprep.subr.mxu1 %v1461_v24 }
 0x406   : > { %2226 = vmatprep.subr.mxu0 %v2469_v0  ;;  %2026 = vmatpush3.msra.mxu1 %v1445_v25 }
 0x407   : > { %2227 = vmatpush3.msra.mxu0 %v1477_v26  ;;  %2027 = vmatprep.subr.mxu1 %v1460_v27 }
 0x408   : > { %2228 = vmatprep.subr.mxu0 %v2469_v0  ;;  %2028 = vmatpush3.msra.mxu1 %v1444_v28 }
 0x409   : > { %2229 = vmatpush3.msra.mxu0 %v1476_v29  ;;  %2029 = vmatprep.subr.mxu1 %v1459_v30 }
 0x40a   : > { %2230 = vmatprep.subr.mxu0 %v2469_v0  ;;  %2030 = vmatpush3.msra.mxu1 %v1443_v31 }
 0x40b   : > { %2231 = vmatpush3.msra.mxu0 %v1475_v32  ;;  %2031 = vmatprep.subr.mxu1 %v1458_v33 }
 0x40c   : > { %2232 = vmatprep.subr.mxu0 %v2469_v0  ;;  %2032 = vmatpush3.msra.mxu1 %v1442_v34 }
 0x40d   : > { %2233 = vmatpush3.msra.mxu0 %v1474_v35  ;;  %2033 = vmatprep.subr.mxu1 %v1457_v36 }
 0x40e   : > { %2234 = vmatprep.subr.mxu0 %v2469_v0  ;;  %2034 = vmatpush3.msra.mxu1 %v1441_v37 }
 0x40f   : > { %2235 = vmatpush3.msra.mxu0 %v1473_v38 }
 0x476   : > { %v505_v59 = vpop.xlane.xlu1 %504 }
 0x477   : > { %v506_v60 = vrot.slane %v505_v59, 4 }
 0x479   : > { %v507_v61 = vadd.f32 %v506_v60, %v505_v59 }
 0x47b   : > { %v508_v62 = vrot.slane %v507_v61, 2 }
 0x47d   : > { %v509_v63 = vadd.f32 %v508_v62, %v507_v61 }
 0x47f   : > { %v510_v1 = vrot.slane %v509_v63, 1 }
 0x481   : > { %v511_v2 = vadd.f32 %v510_v1, %v509_v63 }
 0x483   : > { %v512_v3 = vadd.f32 1.0, %v511_v2 }
 0x485   : > { %v513_v4 = vand.u32 2147483647, %v512_v3  ;;  %v522_v11 = vand.u32 2147483648, %v512_v3 }
 0x487   : > { %v515_v5 = vmul.f32 0.5, %v513_v4 }
 0x489   : > { %v516_v6 = vfloor.f32 %v515_v5 }
 0x48b   : > { %v517_v7 = vmul.f32 2.0, %v516_v6 }
 0x48d   : > { %v518_v8 = vsub.f32 %v513_v4, %v517_v7 }
 0x48f   : > { %vm519_vm5 = vcmp.eq.f32.partialorder %v518_v8, 2.0 }
 0x490   : > { %v520_v9 = vsel %vm519_vm5, 0.0, %v518_v8 }
 0x491   : > { %v521_v10 = vand.u32 2147483647, %v520_v9 }
 0x493   : > { %v523_v13 = vor.u32 %v522_v11, %v521_v10 }
 0x495   : > { %v524_v19 = vmul.f32 3.1415927, %v523_v13 }
 0x497   : > { %v1658_v24 = vmul.f32 %v1786_v21, %v524_v19 }
 0x4af   : > { %v1983_v48 = vpop.f32.mrf.mxu1  ;;  %v1436_v49 = vpop.f32.mrf.mxu0 }
 0x4b1   : > { %v1984_v51 = vpop.f32.mrf.mxu1  ;;  %v2203_v52 = vpop.f32.mrf.mxu0 }
 0x4b2   : > { %v1985_v53 = vadd.f32 %v1984_v51, %v1983_v48 }
 0x4b4   : > { %v1367_v54 = vadd.f32 %v1985_v53, %v1784_v50 }
 0x4b6   : > { %v1437_v55 = vadd.f32 %v1436_v49, %v1367_v54 }
 0x4b8   : > { %v1440_v56 = vmax.f32 %v1437_v55, 0.0 }
 0x4ba   : > { %1567 = vmatprep.mubr.f32.mxu1 %v1440_v56  ;;  %v1491_v57 = vrot.slane %v1440_v56, 7  ;;  %v1494_v58 = vrot.slane %v1440_v56, 1 }
 0x4bc   : > { %1568 = vmatmul.mubr.f32.vlgmr.msra.gmra.mxu1 %v1491_v57  ;;  %2237 = vmatmul.mubr.f32.vlgmr.msra.gmra.mxu0 %v1494_v58 }
 0x57c   : > { %v2035_v14 = vpop.f32.mrf.mxu1  ;;  %v1639_v15 = vpop.f32.mrf.mxu0 }
 0x57e   : > { %v2036_v17 = vpop.f32.mrf.mxu1  ;;  %v2238_v18 = vpop.f32.mrf.mxu0 }
 0x57f   : > { %v2037_v20 = vadd.f32 %v2036_v17, %v2035_v14 }
 0x581   : > { %v1570_v22 = vadd.f32 %v2037_v20, %v1785_v16 }
 0x583   : > { %v1640_v23 = vadd.f32 %v1639_v15, %v1570_v22 }
 0x585   : > { %v1659_v25 = vadd.f32 %v1658_v24, %v1640_v23 }
 0x587   : > { %1661 = vst.msk [vmem:[%s475_s14] sm:$0xff] %vm1660_vm7, %v1659_v25 }
 0x588   : > { %2407 = shalt.err (!%p2404_p0)
}
 0x589   : > { %s2408_s17 = scalar_lea.hbm %s1674_s23, 128  ;;  %s2412_s14 = scalar_lea.hbm %s3116_s13, 256 }
 0x58a   : > { %p2409_p6 = scmp.ne.s32.totalorder %s1674_s23, %s2408_s17  ;;  %p2413_p1 = scmp.lt.s32.totalorder %s1674_s23, %s3116_s13 }
 0x58b   : > { %p2414_p5 = scmp.lt.s32.totalorder %s2412_s14, %s2408_s17 }
 0x58c   : > { %p2410_p9 = pnand %p2409_p6, %p3135_p12 }
 0x58d   : > { %p2415_p3 = por %p2414_p5, %p2413_p1 }
 0x58e   : > { %p2411_p13 = pneg %p2410_p9 }
 0x590   : > { %p2416_p10 = pnand %p2415_p3, %p2411_p13 }
 0x592   : > { %2419 = shalt.err (!%p2416_p10)
}
 0x593   : > { %2251 = dma.vmem_to_hbm [thread:$0]  (%p3135_p12), %s1677_s22, 128, %s1674_s23, %s1663_s30  }
 0x594 PF: > { %s3136_s21 = sld [smem:[#allocation15_spill]]  ;;  %p2273_p2 = scmp.ge.s32.totalorder %s2462_s28, 2 }
 0x595   : > { %s1688_s15 = sand.u32 1, %s2450_s25  }
 0x596   : > { %s1689_s29 = scalar_lea.sflag [#allocation4], %s1688_s15 }
 0x59a   : > { %p3137_p4 = scmp.ne.s32.totalorder %s3136_s21, 0 }
 0x59c   : > { %p2264_p7 = pnand %p2273_p2, %p3137_p4 }
 0x59e   : > { %p2265_p8 = pneg %p2264_p7 }
 0x5a0   : > { %2445 = dma.done.wait (%p2265_p8), %s1689_s29, 128  }
 0x5a1   : > { %2447 = vsyncadd (%p2265_p8), %s1689_s29, 4294967168  ;;  %s3138_s28 = sld [smem:[#allocation13_spill]]  ;;  %s3141_s25 = smov %s2454_s26 }
 0x5a2   : > { %s3139_s24 = sld [smem:[#allocation12_spill]] }
 0x5a3   : > { %s3140_s27 = sld [smem:[#allocation14_spill]] }
 0x5a7   : > { %p25_p11 = scmp.ge.s32.totalorder %s3138_s28, 4  }
 0x5a8   : > { %s3142_s26 = smov %s3139_s24 }
 0x5a9   :  { %27 = sbr.rel (!%p25_p11) target bundleno = 5 (0x5), region = 120 }
 0x5ae   :  { %1694 = vsyncpa [#allocation3], 1 }
 0x5af   :  { %1696 = vsyncpa [#allocation3 + $0x1], 1 }
 0x5b0   :  { %1697 = vsyncpa [#allocation6], 1 }
 0x5b1   :  { %1698 = vsyncpa [#allocation4], 1 }
 0x5b2   :  { %1700 = vsyncpa [#allocation4 + $0x1], 1 }

</bundles_post_ra>
